<compile_context>
chip_gen: v6e
topology: v6e:2x2x1
jax: 0.10.0
libtpu: 0.0.40
codegen_flags: <defaults>
</compile_context>

<pallas_src>
import jax
import jax.numpy as jnp
from jax.experimental import pallas as pl
from jax.experimental.pallas import tpu as pltpu


def _round_up(a: int, m: int) -> int:
    return (a + m - 1) // m * m


def autoencoder_kernel(x_ref, w1_ref, b1_ref, w2_ref, b2_ref, o_ref):
    """One batch tile: sigmoid(relu(x @ W1^T + b1) @ W2^T + b2)."""
    # encoder: Linear + ReLU (f32 operands, f32 MXU accumulation)
    h = jnp.dot(x_ref[...], w1_ref[...],
                precision=jax.lax.Precision.HIGHEST,
                preferred_element_type=jnp.float32)
    h = jnp.maximum(h + b1_ref[...], 0.0)
    # decoder: Linear + Sigmoid
    d = jnp.dot(h, w2_ref[...],
                precision=jax.lax.Precision.HIGHEST,
                preferred_element_type=jnp.float32)
    o_ref[...] = jax.nn.sigmoid(d + b2_ref[...])


def autoencoder_forward(x, w1t, b1, w2t, b2, *, bm=None):
    """x: (B, D) f32.  w1t: (D, E), b1: (1, E), w2t: (E, D), b2: (1, D).

    Returns (B, D) float32 — sigmoid(relu(x @ w1t + b1) @ w2t + b2).
    """
    B, D = x.shape
    E = w1t.shape[1]
    assert w1t.shape == (D, E) and b1.shape == (1, E)
    assert w2t.shape == (E, D) and b2.shape == (1, D)

    # ---- batch tile auto-pick --------------------------------------------
    if bm is None:
        if B >= 2048:
            bm = 1024                           # big tile, many blocks
        elif B >= 16:
            bm = _round_up(pl.cdiv(B, 2), 8)    # exactly two blocks
        else:
            bm = _round_up(max(B, 1), 8)        # single tiny block
    bm = max(8, _round_up(bm, 8))
    # Keep the double-buffered f32 x/out tiles within ~24 MiB of VMEM.
    max_bm = max(8, ((24 << 20) // (16 * D)) // 8 * 8)
    bm = min(bm, max_bm)

    grid_m = pl.cdiv(B, bm)
    if grid_m > 1 and grid_m % 2 == 1:
        # Prefer an even number of "parallel" blocks so both v7x TensorCores
        # stay busy (no effect on v5e/v6e: one TC per chip).
        bm = max(8, _round_up(pl.cdiv(B, grid_m + 1), 8))
        grid_m = pl.cdiv(B, bm)

    # ---- VMEM budget (double-buffered tiles + resident weights + headroom) -
    vmem_need = (
        4 * bm * D * 4          # x + out tiles, 2 buffers each, f32
        + 4 * D * E * 4         # W1^T and W2^T (2 buffers each, DMA'd once)
        + 4 * (D + E) * 4       # biases
        + bm * E * 4            # hidden intermediate
    )
    vmem_limit = int(min(max(vmem_need + (4 << 20), 16 << 20), 48 << 20))

    return pl.pallas_call(
        autoencoder_kernel,
        out_shape=jax.ShapeDtypeStruct((B, D), jnp.float32),
        grid=(grid_m,),
        in_specs=[
            pl.BlockSpec((bm, D), lambda i: (i, 0)),   # x tile (unpadded, f32)
            pl.BlockSpec((D, E), lambda i: (0, 0)),    # W1^T (resident)
            pl.BlockSpec((1, E), lambda i: (0, 0)),    # b1
            pl.BlockSpec((E, D), lambda i: (0, 0)),    # W2^T (resident)
            pl.BlockSpec((1, D), lambda i: (0, 0)),    # b2
        ],
        out_specs=pl.BlockSpec((bm, D), lambda i: (i, 0)),
        compiler_params=pltpu.CompilerParams(
            dimension_semantics=("parallel",),
            vmem_limit_bytes=vmem_limit,
        ),
    )(x, w1t, b1, w2t, b2)


def init_params(key, input_dim, encoding_dim):
    """PyTorch nn.Linear-style init: U(-1/sqrt(fan_in), 1/sqrt(fan_in)).

    Weights are stored transposed relative to PyTorch's (out, in) convention,
    so the kernel computes x @ W^T directly.
    """
    k1, k2, k3, k4 = jax.random.split(key, 4)
    bound1 = 1.0 / jnp.sqrt(input_dim)
    bound2 = 1.0 / jnp.sqrt(encoding_dim)
    w1t = jax.random.uniform(k1, (input_dim, encoding_dim), jnp.float32, -bound1, bound1)
    b1 = jax.random.uniform(k2, (1, encoding_dim), jnp.float32, -bound1, bound1)
    w2t = jax.random.uniform(k3, (encoding_dim, input_dim), jnp.float32, -bound2, bound2)
    b2 = jax.random.uniform(k4, (1, input_dim), jnp.float32, -bound2, bound2)
    return w1t, b1, w2t, b2


if __name__ == "__main__":
    input_dim = 64
    encoding_dim = 32
    batch = 200  # deliberately not a multiple of the tile: exercises the
                 # ragged last grid block (masked writes, no wrapper padding)

    key = jax.random.PRNGKey(0)
    kx, kp = jax.random.split(key)
    x = jax.random.uniform(kx, (batch, input_dim), jnp.float32)  # ratings-like in [0,1]
    w1t, b1, w2t, b2 = init_params(kp, input_dim, encoding_dim)

    out = jax.block_until_ready(autoencoder_forward(x, w1t, b1, w2t, b2))

    # Pure-f32 reference (matches the f32 PyTorch AutoencoderModel.forward).
    h_ref = jnp.maximum(
        jnp.dot(x, w1t, precision=jax.lax.Precision.HIGHEST) + b1, 0.0)
    ref = jax.nn.sigmoid(
        jnp.dot(h_ref, w2t, precision=jax.lax.Precision.HIGHEST) + b2)

    assert out.shape == (batch, input_dim)
    # Tolerance absorbs MXU pass-count differences across TPU generations
    # while still catching real bugs (outputs are sigmoid values in (0, 1)).
    assert jnp.allclose(out, ref, atol=2e-3, rtol=2e-3), float(
        jnp.max(jnp.abs(out - ref)))

    print("KERNEL_OK")
</pallas_src>

<mosaic_0001>
module attributes {stable_mosaic.version = 11 : i64} {
  func.func @autoencoder_kernel(%arg0: i32, %arg1: memref<104x64xf32, #tpu.memory_space<vmem>>, %arg2: memref<64x32xf32, #tpu.memory_space<vmem>>, %arg3: memref<1x32xf32, #tpu.memory_space<vmem>>, %arg4: memref<32x64xf32, #tpu.memory_space<vmem>>, %arg5: memref<1x64xf32, #tpu.memory_space<vmem>>, %arg6: memref<104x64xf32, #tpu.memory_space<vmem>>) attributes {dimension_semantics = [#tpu.dimension_semantics<parallel>], iteration_bounds = array<i64: 2>, scalar_prefetch = 0 : i64, scratch_operands = 0 : i64, tpu.core_type = #tpu.core_type<tc>, window_params = [{transform_indices = @transform_0, window_bounds = array<i64: 104, 64>}, {pipeline_mode = #tpu.pipeline_mode<synchronous>, transform_indices = @transform_1, window_bounds = array<i64: 64, 32>}, {pipeline_mode = #tpu.pipeline_mode<synchronous>, transform_indices = @transform_2, window_bounds = array<i64: 1, 32>}, {pipeline_mode = #tpu.pipeline_mode<synchronous>, transform_indices = @transform_3, window_bounds = array<i64: 32, 64>}, {pipeline_mode = #tpu.pipeline_mode<synchronous>, transform_indices = @transform_4, window_bounds = array<i64: 1, 64>}, {transform_indices = @transform_5, window_bounds = array<i64: 104, 64>}]} {
    %c0 = arith.constant 0 : index
    %c0_0 = arith.constant 0 : index
    %0 = vector.load %arg1[%c0, %c0_0] : memref<104x64xf32, #tpu.memory_space<vmem>>, vector<104x64xf32>
    %c0_1 = arith.constant 0 : index
    %c0_2 = arith.constant 0 : index
    %1 = vector.load %arg2[%c0_1, %c0_2] : memref<64x32xf32, #tpu.memory_space<vmem>>, vector<64x32xf32>
    %cst = arith.constant dense<0.000000e+00> : vector<104x32xf32>
    %2 = tpu.matmul %0, %1, %cst {dimension_numbers = #tpu.dot_dimension_numbers<[1], [0], [0], [1], [0, 0, 1, 1], [], []>, precision = #tpu.contract_precision<fp32>} : vector<104x64xf32>, vector<64x32xf32>, vector<104x32xf32> -> vector<104x32xf32>
    %c0_3 = arith.constant 0 : index
    %c0_4 = arith.constant 0 : index
    %3 = vector.load %arg3[%c0_3, %c0_4] : memref<1x32xf32, #tpu.memory_space<vmem>>, vector<1x32xf32>
    %4 = vector.broadcast %3 : vector<1x32xf32> to vector<104x32xf32>
    %5 = arith.addf %2, %4 : vector<104x32xf32>
    %cst_5 = arith.constant 0.000000e+00 : f32
    %6 = vector.broadcast %cst_5 : f32 to vector<104x32xf32>
    %7 = arith.maximumf %5, %6 : vector<104x32xf32>
    %c0_6 = arith.constant 0 : index
    %c0_7 = arith.constant 0 : index
    %8 = vector.load %arg4[%c0_6, %c0_7] : memref<32x64xf32, #tpu.memory_space<vmem>>, vector<32x64xf32>
    %cst_8 = arith.constant dense<0.000000e+00> : vector<104x64xf32>
    %9 = tpu.matmul %7, %8, %cst_8 {dimension_numbers = #tpu.dot_dimension_numbers<[1], [0], [0], [1], [0, 0, 1, 1], [], []>, precision = #tpu.contract_precision<fp32>} : vector<104x32xf32>, vector<32x64xf32>, vector<104x64xf32> -> vector<104x64xf32>
    %c0_9 = arith.constant 0 : index
    %c0_10 = arith.constant 0 : index
    %10 = vector.load %arg5[%c0_9, %c0_10] : memref<1x64xf32, #tpu.memory_space<vmem>>, vector<1x64xf32>
    %11 = vector.broadcast %10 : vector<1x64xf32> to vector<104x64xf32>
    %12 = arith.addf %9, %11 : vector<104x64xf32>
    %13 = arith.negf %12 : vector<104x64xf32>
    %14 = math.exp %13 : vector<104x64xf32>
    %cst_11 = arith.constant 1.000000e+00 : f32
    %15 = vector.broadcast %cst_11 : f32 to vector<104x64xf32>
    %16 = arith.addf %15, %14 : vector<104x64xf32>
    %17 = arith.divf %15, %16 : vector<104x64xf32>
    %c0_12 = arith.constant 0 : index
    %c0_13 = arith.constant 0 : index
    %18 = vector.load %arg6[%c0_12, %c0_13] : memref<104x64xf32, #tpu.memory_space<vmem>>, vector<104x64xf32>
    tpu.vector_store %arg6[%c0_12, %c0_13], %17 {strides = array<i32>} : memref<104x64xf32, #tpu.memory_space<vmem>>, vector<104x64xf32>,
    return
  }
  func.func @transform_0(%arg0: i32) -> (i32, i32) {
    %c0_i32 = arith.constant 0 : i32
    %c0_i32_0 = arith.constant 0 : i32
    return %arg0, %c0_i32 : i32, i32
  }
  func.func @transform_1(%arg0: i32) -> (i32, i32) {
    %c0_i32 = arith.constant 0 : i32
    %c0_i32_0 = arith.constant 0 : i32
    %c0_i32_1 = arith.constant 0 : i32
    return %c0_i32, %c0_i32_0 : i32, i32
  }
  func.func @transform_2(%arg0: i32) -> (i32, i32) {
    %c0_i32 = arith.constant 0 : i32
    %c0_i32_0 = arith.constant 0 : i32
    %c0_i32_1 = arith.constant 0 : i32
    return %c0_i32, %c0_i32_0 : i32, i32
  }
  func.func @transform_3(%arg0: i32) -> (i32, i32) {
    %c0_i32 = arith.constant 0 : i32
    %c0_i32_0 = arith.constant 0 : i32
    %c0_i32_1 = arith.constant 0 : i32
    return %c0_i32, %c0_i32_0 : i32, i32
  }
  func.func @transform_4(%arg0: i32) -> (i32, i32) {
    %c0_i32 = arith.constant 0 : i32
    %c0_i32_0 = arith.constant 0 : i32
    %c0_i32_1 = arith.constant 0 : i32
    return %c0_i32, %c0_i32_0 : i32, i32
  }
  func.func @transform_5(%arg0: i32) -> (i32, i32) {
    %c0_i32 = arith.constant 0 : i32
    %c0_i32_0 = arith.constant 0 : i32
    return %arg0, %c0_i32 : i32, i32
  }
}

</mosaic_0001>

<bundles_post_ra>
// kernel: tpu_custom_call.1
= control target key start
LH: loop header
LB: loop body
LE: loop exit
PB: predicated region body
PF: predicated region fallthrough
CT: control target
= control target key end

     0   :  { %s3930_s18 = smov 0   ;;  %s3932_s19 = smov 0   ;;  %s5356_s0 = inlined_call_operand.vmem [shape: f32[200,64], index: 0, kind: input, shape index: {}]   ;;  %s5357_s1 = inlined_call_operand.vmem [shape: f32[64,32], index: 1, kind: input, shape index: {}]   ;;  %s5358_s2 = inlined_call_operand.vmem [shape: f32[1,32], index: 2, kind: input, shape index: {}]   ;;  %s5359_s3 = inlined_call_operand.vmem [shape: f32[32,64], index: 3, kind: input, shape index: {}]   ;;  %s5360_s4 = inlined_call_operand.vmem [shape: f32[1,64], index: 4, kind: input, shape index: {}]   ;;  %s5361_s5 = inlined_call_operand.vmem [shape: f32[200,64], index: 5, kind: output, shape index: {}]  }
   0x1   :  { %s3934_s20 = smov 0  }
   0x2 LB: > { %s3943_s21 = sadd.s32 4294967295, %s3864_s20   ;;  %s3945_s22 = sadd.s32 1, %s3864_s20   ;;  %s3864_s20 = sphi %s3934_s20, %s5389_s20   ;;  %s3860_s19 = sphi %s3932_s19, %s5388_s19   ;;  %s3856_s18 = sphi %s3930_s18, %s5387_s18  }
   0x3   : > { %s129_s23 = ssub.s32 %s3864_s20, %s3945_s22  ;;  %s132_s24 = sadd.s32 1, %s3860_s19 }
   0x4   : > { %p130_p0 = scmp.eq.s32.totalorder %s129_s23, 0  ;;  %p142_p1 = scmp.ne.s32.totalorder %s3860_s19, %s3856_s18 }
   0x5   : > { %p143_p2 = scmp.eq.s32.totalorder %s3943_s21, 1  ;;  %p2792_p3 = scmp.ge.s32.totalorder %s3864_s20, 1 }
   0x6   : > { %s3953_s25 = scalar_select %p130_p0, %s3860_s19, %s132_s24  }
   0x7   : > { %p3955_p4 = por %p143_p2, %p142_p1  ;;  %p196_p5 = scmp.lt.s32.totalorder %s3864_s20, 3 }
   0x9   : > { %p197_p6 = pnand %p2792_p3, %p196_p5 }
   0xa   : > { %s3969_s8 = smul.u32 (!%p197_p6), 13, %s3943_s21  ;;  %s224_s20 = sand.u32 (!%p197_p6), 1, %s3856_s18  }
   0xb   : > { %200 = sbr.rel (%p197_p6) target bundleno = 790 (0x316), region = 40 }
   0xc   : > { %p232_p7 = scmp.lt.s32.totalorder (!%p197_p6), %s3969_s8, 24 }
  0x10   : > { %v266_v0 = vld [vmem:[%s5357_s1 + $0x38] sm:$0xff]  ;;  %v265_v1 = vld [vmem:[%s5357_s1 + $0x30] sm:$0xff]  ;;  %v264_v2 = vld [vmem:[%s5357_s1 + $0x28] sm:$0xff]  ;;  %v5371_v3 = vmov 0.0   ;;  %vm3899_vm0 = vmmov 0   ;;  %s233_s23 = scalar_select %p232_p7, %s3969_s8, 24 }
  0x11   : > { %3050 = vmatprep.subr.mxu0 %v5371_v3  ;;  %v3972_v4 = vand.u32 4294901760, %v266_v0  ;;  %v3974_v5 = vand.u32 4294901760, %v265_v1  ;;  %v3976_v6 = vand.u32 4294901760, %v264_v2  ;;  %3105 = vmatprep.subr.mxu1 %v5371_v3  ;;  %v263_v7 = vld [vmem:[%s5357_s1 + $0x20] sm:$0xff]  ;;  %v262_v8 = vld [vmem:[%s5357_s1 + $0x18] sm:$0xff]  ;;  %v261_v9 = vld [vmem:[%s5357_s1 + $0x10] sm:$0xff] }
  0x12   : > { %v3988_v10 = vand.u32 4294901760, %v263_v7  ;;  %v3990_v11 = vand.u32 4294901760, %v262_v8  ;;  %v3992_v12 = vand.u32 4294901760, %v261_v9  ;;  %v260_v13 = vld [vmem:[%s5357_s1 + $0x8] sm:$0xff]  ;;  %v259_v14 = vld [vmem:[%s5357_s1] sm:$0xff]  ;;  %3066 = vmatprep.mubr.msk.f32.mxu0 %vm3899_vm0, %v5371_v3  ;;  %3121 = vmatprep.mubr.msk.f32.mxu1 %vm3899_vm0, %v5371_v3  ;;  %s2793_s24 = sshll.u32 %s233_s23, 3 }
  0x13   : > { %3051 = vmatpush3.msra.mxu0 %v3972_v4  ;;  %v4007_v15 = vsub.f32 %v266_v0, %v3972_v4  ;;  %v4010_v16 = vsub.f32 %v265_v1, %v3974_v5  ;;  %v4013_v17 = vsub.f32 %v264_v2, %v3976_v6  ;;  %v4015_v18 = vand.u32 4294901760, %v260_v13  ;;  %s4050_s29 = scalar_lea.vmem %s5356_s0, %s2793_s24  ;;  %s3662_s23 = smul.u32 104, %s224_s20 }
  0x14   : > { %3052 = vmatprep.subr.mxu0 %v5371_v3  ;;  %v4019_v19 = vsub.f32 %v263_v7, %v3988_v10  ;;  %v4021_v20 = vand.u32 4294901760, %v259_v14  ;;  %v4024_v21 = vsub.f32 %v262_v8, %v3990_v11  ;;  %v4032_v25 = vsub.f32 %v261_v9, %v3992_v12  ;;  %v246_v32 = vld [vmem:[%s4050_s29] sm:$0xff]  ;;  %v247_v34 = vld [vmem:[%s4050_s29 + $0x8] sm:$0xff]  ;;  %v248_v36 = vld [vmem:[%s4050_s29 + $0x10] sm:$0xff]  ;;  %s2531_s24 = ssub.s32 (%p3955_p4), 25, %s3969_s8  ;;  %s2821_s27 = smul.u32 (%p3955_p4), 104, %s3943_s21 }
  0x15   : > { %3053 = vmatpush3.msra.mxu0 %v3974_v5  ;;  %v536_v22 = vand.u32 4294901760, %v4007_v15  ;;  %v543_v23 = vand.u32 4294901760, %v4010_v16  ;;  %v550_v24 = vand.u32 4294901760, %v4013_v17  ;;  %vm274_vm1 = vcmask 523264   ;;  %v249_v43 = vld [vmem:[%s4050_s29 + $0x18] sm:$0xff]  ;;  %v250_v44 = vld [vmem:[%s4050_s29 + $0x20] sm:$0xff] }
  0x16   : > { %3054 = vmatprep.subr.mxu0 %v5371_v3  ;;  %v557_v26 = vand.u32 4294901760, %v4019_v19  ;;  %v564_v27 = vand.u32 4294901760, %v4024_v21  ;;  %v4053_v31 = vsub.f32 %v260_v13, %v4015_v18  ;;  %v571_v33 = vand.u32 4294901760, %v4032_v25  ;;  %v251_v61 = vld [vmem:[%s4050_s29 + $0x28] sm:$0xff]  ;;  %v252_v9 = vld [vmem:[%s4050_s29 + $0x30] sm:$0xff]  ;;  %s5232_s18 = scalar_lea.vmem [#allocation2], %s3662_s23   ;;  %s5274_s30 = scalar_lea.vmem (%p3955_p4), %s5361_s5, %s2821_s27  }
  0x17   : > { %3055 = vmatpush3.msra.mxu0 %v3976_v6  ;;  %v537_v28 = vsub.f32 %v4007_v15, %v536_v22  ;;  %v544_v29 = vsub.f32 %v4010_v16, %v543_v23  ;;  %v551_v30 = vsub.f32 %v4013_v17, %v550_v24  ;;  %v4060_v35 = vsub.f32 %v259_v14, %v4021_v20  ;;  %p2532_p8 = scmp.lt.s32.totalorder (%p3955_p4), %s2531_s24, 13 }
  0x18   : > { %3056 = vmatprep.subr.mxu0 %v5371_v3  ;;  %v558_v39 = vsub.f32 %v4019_v19, %v557_v26  ;;  %v276_v40 = vsel %vm274_vm1, %v246_v32, 0  ;;  %v565_v41 = vsub.f32 %v4024_v21, %v564_v27  ;;  %v578_v46 = vand.u32 4294901760, %v4053_v31 }
  0x19   : > { %3057 = vmatpush3.msra.mxu0 %v3988_v10  ;;  %v538_v37 = vand.u32 4294901760, %v537_v28  ;;  %v545_v38 = vand.u32 4294901760, %v544_v29  ;;  %v4072_v42 = vand.u32 4294901760, %v276_v40  ;;  %v552_v45 = vand.u32 4294901760, %v551_v30 }
  0x1a   : > { %3058 = vmatprep.subr.mxu0 %v5371_v3  ;;  %v279_v47 = vsel %vm274_vm1, %v247_v34, 0  ;;  %v282_v48 = vsel %vm274_vm1, %v248_v36, 0  ;;  %v585_v51 = vand.u32 4294901760, %v4060_v35  ;;  %v559_v53 = vand.u32 4294901760, %v558_v39 }
  0x1b   : > { %3106 = vmatpush3.msra.mxu1 %v538_v37  ;;  %3059 = vmatpush3.msra.mxu0 %v3990_v11  ;;  %v4083_v49 = vsub.f32 %v276_v40, %v4072_v42  ;;  %v4085_v50 = vand.u32 4294901760, %v279_v47  ;;  %v4088_v52 = vand.u32 4294901760, %v282_v48  ;;  %v572_v54 = vsub.f32 %v4032_v25, %v571_v33 }
  0x1c   : > { %3107 = vmatprep.subr.mxu1 %v5371_v3  ;;  %3060 = vmatprep.subr.mxu0 %v5371_v3  ;;  %v285_v55 = vsel %vm274_vm1, %v249_v43, 0  ;;  %v288_v56 = vsel %vm274_vm1, %v250_v44, 0  ;;  %v566_v62 = vand.u32 4294901760, %v565_v41  ;;  %v579_v63 = vsub.f32 %v4053_v31, %v578_v46  ;;  %v253_v41 = vld [vmem:[%s4050_s29 + $0x38] sm:$0xff] }
  0x1d   : > { %3108 = vmatpush3.msra.mxu1 %v545_v38  ;;  %3061 = vmatpush3.msra.mxu0 %v3992_v12  ;;  %v389_v57 = vand.u32 4294901760, %v4083_v49  ;;  %v4100_v58 = vsub.f32 %v279_v47, %v4085_v50  ;;  %v4103_v59 = vsub.f32 %v282_v48, %v4088_v52  ;;  %v4105_v60 = vand.u32 4294901760, %v285_v55 }
  0x1e   : > { %3109 = vmatprep.subr.mxu1 %v5371_v3  ;;  %3062 = vmatprep.subr.mxu0 %v5371_v3  ;;  %v4112_v0 = vand.u32 4294901760, %v288_v56  ;;  %v573_v13 = vand.u32 4294901760, %v572_v54  ;;  %v586_v14 = vsub.f32 %v4060_v35, %v585_v51  ;;  %v291_v28 = vsel %vm274_vm1, %v251_v61, 0 }
  0x1f   : > { %3110 = vmatpush3.msra.mxu1 %v552_v45  ;;  %3063 = vmatpush3.msra.mxu0 %v4015_v18  ;;  %v390_v1 = vsub.f32 %v4083_v49, %v389_v57  ;;  %v399_v2 = vand.u32 4294901760, %v4100_v58  ;;  %v409_v7 = vand.u32 4294901760, %v4103_v59  ;;  %v4122_v8 = vsub.f32 %v285_v55, %v4105_v60  ;;  %v254_v55 = vld [vmem:[%s4050_s29 + $0x40] sm:$0xff] }
  0x20   : > { %3111 = vmatprep.subr.mxu1 %v5371_v3  ;;  %3064 = vmatprep.subr.mxu0 %v5371_v3  ;;  %v580_v32 = vand.u32 4294901760, %v579_v63  ;;  %v4136_v34 = vsub.f32 %v288_v56, %v4112_v0  ;;  %v294_v36 = vsel %vm274_vm1, %v252_v9, 0  ;;  %v4144_v40 = vand.u32 4294901760, %v291_v28 }
  0x21   : > { %3112 = vmatpush3.msra.mxu1 %v559_v53  ;;  %3065 = vmatpush3.msra.mxu0 %v4021_v20  ;;  %v391_v29 = vand.u32 4294901760, %v390_v1  ;;  %v400_v30 = vsub.f32 %v4100_v58, %v399_v2  ;;  %v410_v38 = vsub.f32 %v4103_v59, %v409_v7  ;;  %v419_v39 = vand.u32 4294901760, %v4122_v8 }
  0x22   : > { %3113 = vmatprep.subr.mxu1 %v5371_v3  ;;  %3160 = vmatprep.subr.mxu0 %v5371_v3  ;;  %v587_v43 = vand.u32 4294901760, %v586_v14  ;;  %v4152_v44 = vand.u32 4294901760, %v294_v36  ;;  %v297_v45 = vsel %vm274_vm1, %v253_v41, 0  ;;  %v429_v53 = vand.u32 4294901760, %v4136_v34 }
  0x23   : > { %3114 = vmatpush3.msra.mxu1 %v566_v62  ;;  %3067 = vmatmul.mubr.f32.vlgmr.msra.gmra.mxu0 %v391_v29  ;;  %v401_v37 = vand.u32 4294901760, %v400_v30  ;;  %v411_v47 = vand.u32 4294901760, %v410_v38  ;;  %v420_v48 = vsub.f32 %v4122_v8, %v419_v39  ;;  %v4161_v54 = vsub.f32 %v291_v28, %v4144_v40 }
  0x24   : > { %3115 = vmatprep.subr.mxu1 %v5371_v3  ;;  %3069 = vmatprep.mubr.msk.f32.mxu0 %vm3899_vm0, %v5371_v3  ;;  %v4171_v56 = vand.u32 4294901760, %v297_v45  ;;  %v430_v62 = vsub.f32 %v4136_v34, %v429_v53  ;;  %v4179_v1 = vsub.f32 %v294_v36, %v4152_v44  ;;  %v300_v9 = vsel %vm274_vm1, %v254_v55, 0  ;;  %v256_v36 = vld [vmem:[%s4050_s29 + $0x50] sm:$0xff]  ;;  %v257_v55 = vld [vmem:[%s4050_s29 + $0x58] sm:$0xff] }
  0x25   : > { %3116 = vmatpush3.msra.mxu1 %v573_v13  ;;  %3161 = vmatpush3.msra.mxu0 %v4007_v15  ;;  %v421_v61 = vand.u32 4294901760, %v420_v48  ;;  %v439_v63 = vand.u32 4294901760, %v4161_v54  ;;  %v255_v13 = vld [vmem:[%s4050_s29 + $0x48] sm:$0xff]  ;;  %v306_v41 = vsel %vm274_vm1, %v256_v36, 0  ;;  %v258_v36 = vld [vmem:[%s4050_s29 + $0x60] sm:$0xff]  ;;  %vm1391_vm2 = vcmask 261120  }
  0x26   : > { %3117 = vmatprep.subr.mxu1 %v5371_v3  ;;  %3162 = vmatprep.subr.mxu0 %v5371_v3  ;;  %v4192_v14 = vsub.f32 %v297_v45, %v4171_v56  ;;  %v431_v28 = vand.u32 4294901760, %v430_v62  ;;  %v5363_v30 = vand.u32 4294901760, %v4179_v1  ;;  %v4234_v62 = vand.u32 4294901760, %v306_v41 }
  0x27   : > { %3118 = vmatpush3.msra.mxu1 %v580_v32  ;;  %3070 = vmatmul.mubr.f32.gmra.mxu0 %v401_v37  ;;  %v440_v29 = vsub.f32 %v4161_v54, %v439_v63  ;;  %v4199_v32 = vand.u32 4294901760, %v300_v9  ;;  %v303_v37 = vsel %vm274_vm1, %v255_v13, 0 }
  0x28   : > { %3119 = vmatprep.subr.mxu1 %v5371_v3  ;;  %3072 = vmatprep.mubr.msk.f32.mxu0 %vm3899_vm0, %v5371_v3  ;;  %v5362_v38 = vand.u32 4294901760, %v4192_v14  ;;  %v450_v45 = vsub.f32 %v4179_v1, %v5363_v30  ;;  %v4220_v48 = vand.u32 4294901760, %v303_v37  ;;  %v312_v30 = vsel %vm274_vm1, %v258_v36, 0 }
  0x29   : > { %3120 = vmatpush3.msra.mxu1 %v587_v43  ;;  %3163 = vmatpush3.msra.mxu0 %v4010_v16  ;;  %v441_v43 = vand.u32 4294901760, %v440_v29  ;;  %v309_v29 = vsel %vm274_vm1, %v257_v55, 0 }
  0x2a   : > { %3122 = vmatmul.mubr.f32.vlgmr.msra.gmra.mxu1 %v4072_v42  ;;  %3215 = vmatprep.subr.mxu1 %v5371_v3 }
  0x2b   : > { %3216 = vmatpush3.msra.mxu1 %v3972_v4  ;;  %3124 = vmatprep.mubr.msk.f32.mxu1 %vm3899_vm0, %v5371_v3 }
  0x2c   : > { %3073 = vmatmul.mubr.f32.gmra.mxu0 %v411_v47  ;;  %3217 = vmatprep.subr.mxu1 %v5371_v3  ;;  %v4218_v47 = vsub.f32 %v300_v9, %v4199_v32  ;;  %v451_v9 = vand.u32 4294901760, %v450_v45 }
  0x2d   : > { %3075 = vmatprep.mubr.msk.f32.mxu0 %vm3899_vm0, %v5371_v3  ;;  %3164 = vmatprep.subr.mxu0 %v5371_v3 }
  0x2e   : > { %3125 = vmatmul.mubr.f32.gmra.mxu1 %v4085_v50  ;;  %3165 = vmatpush3.msra.mxu0 %v4013_v17  ;;  %v5364_v13 = vand.u32 4294901760, %v4218_v47 }
  0x2f   : > { %3127 = vmatprep.mubr.msk.f32.mxu1 %vm3899_vm0, %v5371_v3  ;;  %3218 = vmatpush3.msra.mxu1 %v3974_v5 }
  0x30   : > { %3076 = vmatmul.mubr.f32.gmra.mxu0 %v421_v61  ;;  %3219 = vmatprep.subr.mxu1 %v5371_v3  ;;  %v460_v61 = vsub.f32 %v4192_v14, %v5362_v38  ;;  %v470_v45 = vsub.f32 %v4218_v47, %v5364_v13  ;;  %v4259_v38 = vsub.f32 %v306_v41, %v4234_v62  ;;  %v4278_v13 = vand.u32 4294901760, %v312_v30 }
  0x31   : > { %3078 = vmatprep.mubr.msk.f32.mxu0 %vm3899_vm0, %v5371_v3  ;;  %3166 = vmatprep.subr.mxu0 %v5371_v3 }
  0x32   : > { %3128 = vmatmul.mubr.f32.gmra.mxu1 %v4088_v52  ;;  %3167 = vmatpush3.msra.mxu0 %v4019_v19  ;;  %v471_v41 = vand.u32 4294901760, %v470_v45  ;;  %v5366_v36 = vand.u32 4294901760, %v4259_v38 }
  0x33   : > { %3130 = vmatprep.mubr.msk.f32.mxu1 %vm3899_vm0, %v5371_v3  ;;  %3220 = vmatpush3.msra.mxu1 %v3976_v6 }
  0x34   : > { %3079 = vmatmul.mubr.f32.gmra.mxu0 %v431_v28  ;;  %3221 = vmatprep.subr.mxu1 %v5371_v3  ;;  %v4239_v28 = vsub.f32 %v303_v37, %v4220_v48  ;;  %v461_v37 = vand.u32 4294901760, %v460_v61 }
  0x35   : > { %3081 = vmatprep.mubr.msk.f32.mxu0 %vm3899_vm0, %v5371_v3  ;;  %3168 = vmatprep.subr.mxu0 %v5371_v3 }
  0x36   : > { %3131 = vmatmul.mubr.f32.gmra.mxu1 %v4105_v60  ;;  %3169 = vmatpush3.msra.mxu0 %v4024_v21  ;;  %v5365_v55 = vand.u32 4294901760, %v4239_v28 }
  0x37   : > { %3133 = vmatprep.mubr.msk.f32.mxu1 %vm3899_vm0, %v5371_v3  ;;  %3222 = vmatpush3.msra.mxu1 %v3988_v10 }
  0x38   : > { %3082 = vmatmul.mubr.f32.gmra.mxu0 %v441_v43  ;;  %3223 = vmatprep.subr.mxu1 %v5371_v3  ;;  %v4251_v43 = vand.u32 4294901760, %v309_v29 }
  0x39   : > { %3084 = vmatprep.mubr.msk.f32.mxu0 %vm3899_vm0, %v5371_v3  ;;  %3170 = vmatprep.subr.mxu0 %v5371_v3 }
  0x3a   : > { %3134 = vmatmul.mubr.f32.gmra.mxu1 %v4112_v0  ;;  %3171 = vmatpush3.msra.mxu0 %v4032_v25  ;;  %v4271_v61 = vsub.f32 %v309_v29, %v4251_v43 }
  0x3b   : > { %3136 = vmatprep.mubr.msk.f32.mxu1 %vm3899_vm0, %v5371_v3  ;;  %3224 = vmatpush3.msra.mxu1 %v3990_v11 }
  0x3c   : > { %3085 = vmatmul.mubr.f32.gmra.mxu0 %v451_v9  ;;  %3225 = vmatprep.subr.mxu1 %v5371_v3  ;;  %v480_v9 = vsub.f32 %v4239_v28, %v5365_v55  ;;  %v499_v45 = vand.u32 4294901760, %v4271_v61  ;;  %v4293_v55 = vsub.f32 %v312_v30, %v4278_v13 }
  0x3d   : > { %3087 = vmatprep.mubr.msk.f32.mxu0 %vm3899_vm0, %v5371_v3  ;;  %3172 = vmatprep.subr.mxu0 %v5371_v3 }
  0x3e   : > { %3137 = vmatmul.mubr.f32.gmra.mxu1 %v4144_v40  ;;  %3173 = vmatpush3.msra.mxu0 %v4053_v31  ;;  %v481_v29 = vand.u32 4294901760, %v480_v9  ;;  %v500_v30 = vsub.f32 %v4271_v61, %v499_v45  ;;  %v509_v9 = vand.u32 4294901760, %v4293_v55 }
  0x3f   : > { %3139 = vmatprep.mubr.msk.f32.mxu1 %vm3899_vm0, %v5371_v3  ;;  %3226 = vmatpush3.msra.mxu1 %v3992_v12 }
  0x40   : > { %3088 = vmatmul.mubr.f32.gmra.mxu0 %v461_v37  ;;  %3227 = vmatprep.subr.mxu1 %v5371_v3  ;;  %v490_v37 = vsub.f32 %v4259_v38, %v5366_v36  ;;  %v501_v36 = vand.u32 4294901760, %v500_v30 }
  0x41   : > { %3090 = vmatprep.mubr.msk.f32.mxu0 %vm3899_vm0, %v5371_v3  ;;  %3174 = vmatprep.subr.mxu0 %v5371_v3 }
  0x42   : > { %3140 = vmatmul.mubr.f32.gmra.mxu1 %v4152_v44  ;;  %3175 = vmatpush3.msra.mxu0 %v4060_v35  ;;  %v1380_v35 = vld [vmem:[%s5359_s3] sm:$0xff] }
  0x43   : > { %3142 = vmatprep.mubr.msk.f32.mxu1 %vm3899_vm0, %v5371_v3  ;;  %3228 = vmatpush3.msra.mxu1 %v4015_v18 }
  0x44   : > { %3091 = vmatmul.mubr.f32.gmra.mxu0 %v471_v41  ;;  %3229 = vmatprep.subr.mxu1 %v5371_v3  ;;  %v491_v41 = vand.u32 4294901760, %v490_v37 }
  0x45   : > { %3093 = vmatprep.mubr.msk.f32.mxu0 %vm3899_vm0, %v5371_v3  ;;  %3270 = vmatprep.subr.mxu0 %v5371_v3 }
  0x46   : > { %3143 = vmatmul.mubr.f32.gmra.mxu1 %v4171_v56 }
  0x47   : > { %3145 = vmatprep.mubr.msk.f32.mxu1 %vm3899_vm0, %v5371_v3  ;;  %3230 = vmatpush3.msra.mxu1 %v4021_v20 }
  0x48   : > { %3094 = vmatmul.mubr.f32.gmra.mxu0 %v481_v29  ;;  %3325 = vmatprep.subr.mxu1 %v5371_v3  ;;  %v510_v29 = vsub.f32 %v4293_v55, %v509_v9 }
  0x49   : > { %3096 = vmatprep.mubr.msk.f32.mxu0 %vm3899_vm0, %v5371_v3 }
  0x4a   : > { %3146 = vmatmul.mubr.f32.gmra.mxu1 %v4199_v32  ;;  %v511_v37 = vand.u32 4294901760, %v510_v29 }
  0x4b   : > { %3148 = vmatprep.mubr.msk.f32.mxu1 %vm3899_vm0, %v5371_v3 }
  0x4c   : > { %3097 = vmatmul.mubr.f32.gmra.mxu0 %v491_v41 }
  0x4d   : > { %3099 = vmatprep.mubr.msk.f32.mxu0 %vm3899_vm0, %v5371_v3 }
  0x4e   : > { %3149 = vmatmul.mubr.f32.gmra.mxu1 %v4220_v48 }
  0x4f   : > { %3151 = vmatprep.mubr.msk.f32.mxu1 %vm3899_vm0, %v5371_v3 }
  0x50   : > { %3100 = vmatmul.mubr.f32.gmra.mxu0 %v501_v36 }
  0x51   : > { %3102 = vmatprep.mubr.msk.f32.mxu0 %vm3899_vm0, %v5371_v3 }
  0x52   : > { %3152 = vmatmul.mubr.f32.gmra.mxu1 %v4234_v62 }
  0x53   : > { %3154 = vmatprep.mubr.msk.f32.mxu1 %vm3899_vm0, %v5371_v3 }
  0x54   : > { %3103 = vmatmul.mubr.f32.gmra.mxu0 %v511_v37 }
  0x55   : > { %3176 = vmatprep.mubr.msk.f32.mxu0 %vm3899_vm0, %v5371_v3 }
  0x56   : > { %3155 = vmatmul.mubr.f32.gmra.mxu1 %v4251_v43 }
  0x57   : > { %3157 = vmatprep.mubr.msk.f32.mxu1 %vm3899_vm0, %v5371_v3 }
  0x58   : > { %3177 = vmatmul.mubr.f32.vlgmr.msra.gmra.mxu0 %v4083_v49 }
  0x59   : > { %3179 = vmatprep.mubr.msk.f32.mxu0 %vm3899_vm0, %v5371_v3  ;;  %3271 = vmatpush3.msra.mxu0 %v536_v22 }
  0x5a   : > { %3158 = vmatmul.mubr.f32.gmra.mxu1 %v4278_v13  ;;  %3272 = vmatprep.subr.mxu0 %v5371_v3 }
  0x5b   : > { %3231 = vmatprep.mubr.msk.f32.mxu1 %vm3899_vm0, %v5371_v3  ;;  %3273 = vmatpush3.msra.mxu0 %v543_v23 }
  0x5c   : > { %3180 = vmatmul.mubr.f32.gmra.mxu0 %v4100_v58  ;;  %3274 = vmatprep.subr.mxu0 %v5371_v3  ;;  %v4607_v58 = vld [vmem:[%s5358_s2] ss:$0 sm:$0xff] }
  0x5d   : > { %3182 = vmatprep.mubr.msk.f32.mxu0 %vm3899_vm0, %v5371_v3  ;;  %3275 = vmatpush3.msra.mxu0 %v550_v24 }
  0x5e   : > { %3232 = vmatmul.mubr.f32.vlgmr.msra.gmra.mxu1 %v389_v57  ;;  %3276 = vmatprep.subr.mxu0 %v5371_v3 }
  0x5f   : > { %3326 = vmatpush3.msra.mxu1 %v3972_v4  ;;  %3234 = vmatprep.mubr.msk.f32.mxu1 %vm3899_vm0, %v5371_v3  ;;  %v5374_v4 = vand.u32 4294901760, %v4179_v1 }
  0x60   : > { %3183 = vmatmul.mubr.f32.gmra.mxu0 %v4103_v59  ;;  %3327 = vmatprep.subr.mxu1 %v5371_v3 }
  0x61   : > { %3185 = vmatprep.mubr.msk.f32.mxu0 %vm3899_vm0, %v5371_v3  ;;  %3328 = vmatpush3.msra.mxu1 %v3974_v5  ;;  %v5375_v5 = vand.u32 4294901760, %v4192_v14 }
  0x62   : > { %3235 = vmatmul.mubr.f32.gmra.mxu1 %v399_v2  ;;  %3329 = vmatprep.subr.mxu1 %v5371_v3 }
  0x63   : > { %3237 = vmatprep.mubr.msk.f32.mxu1 %vm3899_vm0, %v5371_v3  ;;  %3330 = vmatpush3.msra.mxu1 %v3976_v6  ;;  %v5376_v6 = vand.u32 4294901760, %v4218_v47 }
  0x64   : > { %3186 = vmatmul.mubr.f32.gmra.mxu0 %v4122_v8  ;;  %3331 = vmatprep.subr.mxu1 %v5371_v3 }
  0x65   : > { %3188 = vmatprep.mubr.msk.f32.mxu0 %vm3899_vm0, %v5371_v3  ;;  %3277 = vmatpush3.msra.mxu0 %v557_v26  ;;  %v1381_v26 = vld [vmem:[%s5359_s3 + $0x8] sm:$0xff] }
  0x66   : > { %3238 = vmatmul.mubr.f32.gmra.mxu1 %v409_v7  ;;  %3278 = vmatprep.subr.mxu0 %v5371_v3 }
  0x67   : > { %3240 = vmatprep.mubr.msk.f32.mxu1 %vm3899_vm0, %v5371_v3  ;;  %3332 = vmatpush3.msra.mxu1 %v3988_v10  ;;  %v5377_v10 = vand.u32 4294901760, %v4239_v28 }
  0x68   : > { %3189 = vmatmul.mubr.f32.gmra.mxu0 %v4136_v34  ;;  %3333 = vmatprep.subr.mxu1 %v5371_v3 }
  0x69   : > { %3191 = vmatprep.mubr.msk.f32.mxu0 %vm3899_vm0, %v5371_v3  ;;  %3279 = vmatpush3.msra.mxu0 %v564_v27  ;;  %v4577_v27 = vand.u32 4294901760, %v1381_v26 }
  0x6a   : > { %3241 = vmatmul.mubr.f32.gmra.mxu1 %v419_v39  ;;  %3280 = vmatprep.subr.mxu0 %v5371_v3 }
  0x6b   : > { %3243 = vmatprep.mubr.msk.f32.mxu1 %vm3899_vm0, %v5371_v3  ;;  %3334 = vmatpush3.msra.mxu1 %v3990_v11  ;;  %v5378_v11 = vand.u32 4294901760, %v4259_v38  ;;  %v4581_v31 = vsub.f32 %v1381_v26, %v4577_v27 }
  0x6c   : > { %3192 = vmatmul.mubr.f32.gmra.mxu0 %v4161_v54  ;;  %3335 = vmatprep.subr.mxu1 %v5371_v3 }
  0x6d   : > { %3194 = vmatprep.mubr.msk.f32.mxu0 %vm3899_vm0, %v5371_v3  ;;  %3281 = vmatpush3.msra.mxu0 %v571_v33  ;;  %v5368_v33 = vand.u32 4294901760, %v4581_v31 }
  0x6e   : > { %3244 = vmatmul.mubr.f32.gmra.mxu1 %v429_v53  ;;  %3282 = vmatprep.subr.mxu0 %v5371_v3 }
  0x6f   : > { %3246 = vmatprep.mubr.msk.f32.mxu1 %vm3899_vm0, %v5371_v3  ;;  %3336 = vmatpush3.msra.mxu1 %v3992_v12  ;;  %v1383_v12 = vld [vmem:[%s5359_s3 + $0x18] sm:$0xff] }
  0x70   : > { %3195 = vmatmul.mubr.f32.gmra.mxu0 %v4179_v1  ;;  %3337 = vmatprep.subr.mxu1 %v5371_v3  ;;  %v4521_v15 = vand.u32 4294901760, %v1383_v12 }
  0x71   : > { %3197 = vmatprep.mubr.msk.f32.mxu0 %vm3899_vm0, %v5371_v3  ;;  %3283 = vmatpush3.msra.mxu0 %v578_v46  ;;  %v1672_v46 = vsub.f32 %v4581_v31, %v5368_v33 }
  0x72   : > { %3247 = vmatmul.mubr.f32.gmra.mxu1 %v439_v63  ;;  %3284 = vmatprep.subr.mxu0 %v5371_v3  ;;  %v4528_v16 = vsub.f32 %v1383_v12, %v4521_v15 }
  0x73   : > { %3249 = vmatprep.mubr.msk.f32.mxu1 %vm3899_vm0, %v5371_v3  ;;  %3338 = vmatpush3.msra.mxu1 %v4015_v18 }
  0x74   : > { %3198 = vmatmul.mubr.f32.gmra.mxu0 %v4192_v14  ;;  %3339 = vmatprep.subr.mxu1 %v5371_v3  ;;  %v5370_v17 = vand.u32 4294901760, %v4528_v16 }
  0x75   : > { %3200 = vmatprep.mubr.msk.f32.mxu0 %vm3899_vm0, %v5371_v3  ;;  %3285 = vmatpush3.msra.mxu0 %v585_v51 }
  0x76   : > { %3250 = vmatmul.mubr.f32.gmra.mxu1 %v5374_v4  ;;  %3380 = vmatprep.subr.mxu0 %v5371_v3  ;;  %v1658_v18 = vsub.f32 %v4528_v16, %v5370_v17 }
  0x77   : > { %3252 = vmatprep.mubr.msk.f32.mxu1 %vm3899_vm0, %v5371_v3  ;;  %3340 = vmatpush3.msra.mxu1 %v4021_v20  ;;  %v1382_v20 = vld [vmem:[%s5359_s3 + $0x10] sm:$0xff] }
  0x78   : > { %3201 = vmatmul.mubr.f32.gmra.mxu0 %v4218_v47  ;;  %3427 = vmatprep.subr.mxu1 %v5371_v3  ;;  %v1659_v19 = vand.u32 4294901760, %v1658_v18  ;;  %v4557_v21 = vand.u32 4294901760, %v1382_v20 }
  0x79   : > { %3203 = vmatprep.mubr.msk.f32.mxu0 %vm3899_vm0, %v5371_v3 }
  0x7a   : > { %3253 = vmatmul.mubr.f32.gmra.mxu1 %v5375_v5  ;;  %v4563_v22 = vsub.f32 %v1382_v20, %v4557_v21 }
  0x7b   : > { %3255 = vmatprep.mubr.msk.f32.mxu1 %vm3899_vm0, %v5371_v3 }
  0x7c   : > { %3204 = vmatmul.mubr.f32.gmra.mxu0 %v4239_v28  ;;  %v5369_v23 = vand.u32 4294901760, %v4563_v22 }
  0x7d   : > { %3206 = vmatprep.mubr.msk.f32.mxu0 %vm3899_vm0, %v5371_v3 }
  0x7e   : > { %3256 = vmatmul.mubr.f32.gmra.mxu1 %v5376_v6  ;;  %v1665_v24 = vsub.f32 %v4563_v22, %v5369_v23 }
  0x7f   : > { %3258 = vmatprep.mubr.msk.f32.mxu1 %vm3899_vm0, %v5371_v3 }
  0x80   : > { %3207 = vmatmul.mubr.f32.gmra.mxu0 %v4259_v38  ;;  %v1666_v25 = vand.u32 4294901760, %v1665_v24 }
  0x81   : > { %3209 = vmatprep.mubr.msk.f32.mxu0 %vm3899_vm0, %v5371_v3 }
  0x82   : > { %3259 = vmatmul.mubr.f32.gmra.mxu1 %v5377_v10 }
  0x83   : > { %3261 = vmatprep.mubr.msk.f32.mxu1 %vm3899_vm0, %v5371_v3 }
  0x84   : > { %3210 = vmatmul.mubr.f32.gmra.mxu0 %v4271_v61 }
  0x85   : > { %3212 = vmatprep.mubr.msk.f32.mxu0 %vm3899_vm0, %v5371_v3 }
  0x86   : > { %3262 = vmatmul.mubr.f32.gmra.mxu1 %v5378_v11 }
  0x87   : > { %3264 = vmatprep.mubr.msk.f32.mxu1 %vm3899_vm0, %v5371_v3 }
  0x88   : > { %3213 = vmatmul.mubr.f32.gmra.mxu0 %v4293_v55 }
  0x89   : > { %3286 = vmatprep.mubr.msk.f32.mxu0 %vm3899_vm0, %v5371_v3 }
  0x8a   : > { %3265 = vmatmul.mubr.f32.gmra.mxu1 %v499_v45 }
  0x8b   : > { %3267 = vmatprep.mubr.msk.f32.mxu1 %vm3899_vm0, %v5371_v3 }
  0x8c   : > { %3287 = vmatmul.mubr.f32.vlgmr.msra.gmra.mxu0 %v4072_v42 }
  0x8d   : > { %3289 = vmatprep.mubr.msk.f32.mxu0 %vm3899_vm0, %v5371_v3  ;;  %3381 = vmatpush3.msra.mxu0 %v4521_v15 }
  0x8e   : > { %3268 = vmatmul.mubr.f32.gmra.mxu1 %v509_v9  ;;  %3382 = vmatprep.subr.mxu0 %v5371_v3 }
  0x8f   : > { %3341 = vmatprep.mubr.msk.f32.mxu1 %vm3899_vm0, %v5371_v3  ;;  %3383 = vmatpush3.msra.mxu0 %v4557_v21 }
  0x90   : > { %3290 = vmatmul.mubr.f32.gmra.mxu0 %v4085_v50  ;;  %3384 = vmatprep.subr.mxu0 %v5371_v3 }
  0x91   : > { %3292 = vmatprep.mubr.msk.f32.mxu0 %vm3899_vm0, %v5371_v3  ;;  %3385 = vmatpush3.msra.mxu0 %v4577_v27 }
  0x92   : > { %3342 = vmatmul.mubr.f32.vlgmr.msra.gmra.mxu1 %v4072_v42  ;;  %3386 = vmatprep.subr.mxu0 %v5371_v3  ;;  %v4588_v42 = vand.u32 4294901760, %v1380_v35 }
  0x93   : > { %3344 = vmatprep.mubr.msk.f32.mxu1 %vm3899_vm0, %v5371_v3  ;;  %3428 = vmatpush3.msra.mxu1 %v1659_v19 }
  0x94   : > { %3293 = vmatmul.mubr.f32.gmra.mxu0 %v4088_v52  ;;  %3429 = vmatprep.subr.mxu1 %v5371_v3  ;;  %v4595_v49 = vsub.f32 %v1380_v35, %v4588_v42 }
  0x95   : > { %3295 = vmatprep.mubr.msk.f32.mxu0 %vm3899_vm0, %v5371_v3  ;;  %3430 = vmatpush3.msra.mxu1 %v1666_v25 }
  0x96   : > { %3345 = vmatmul.mubr.f32.gmra.mxu1 %v4085_v50  ;;  %3431 = vmatprep.subr.mxu1 %v5371_v3  ;;  %v1673_v50 = vand.u32 4294901760, %v1672_v46  ;;  %v5367_v51 = vand.u32 4294901760, %v4595_v49 }
  0x97   : > { %3347 = vmatprep.mubr.msk.f32.mxu1 %vm3899_vm0, %v5371_v3  ;;  %3387 = vmatpush3.msra.mxu0 %v4588_v42 }
  0x98   : > { %3296 = vmatmul.mubr.f32.gmra.mxu0 %v4105_v60  ;;  %3474 = vmatprep.subr.mxu0 %v5371_v3 }
  0x99   : > { %3298 = vmatprep.mubr.msk.f32.mxu0 %vm3899_vm0, %v5371_v3  ;;  %3432 = vmatpush3.msra.mxu1 %v1673_v50 }
  0x9a   : > { %3348 = vmatmul.mubr.f32.gmra.mxu1 %v4088_v52  ;;  %3433 = vmatprep.subr.mxu1 %v5371_v3  ;;  %v1679_v52 = vsub.f32 %v4595_v49, %v5367_v51 }
  0x9b   : > { %3350 = vmatprep.mubr.msk.f32.mxu1 %vm3899_vm0, %v5371_v3 }
  0x9c   : > { %3299 = vmatmul.mubr.f32.gmra.mxu0 %v4112_v0  ;;  %v1680_v57 = vand.u32 4294901760, %v1679_v52 }
  0x9d   : > { %3301 = vmatprep.mubr.msk.f32.mxu0 %vm3899_vm0, %v5371_v3 }
  0x9e   : > { %3351 = vmatmul.mubr.f32.gmra.mxu1 %v4105_v60 }
  0x9f   : > { %3353 = vmatprep.mubr.msk.f32.mxu1 %vm3899_vm0, %v5371_v3  ;;  %3434 = vmatpush3.msra.mxu1 %v1680_v57 }
  0xa0   : > { %3302 = vmatmul.mubr.f32.gmra.mxu0 %v4144_v40  ;;  %3521 = vmatprep.subr.mxu1 %v5371_v3 }
  0xa1   : > { %3304 = vmatprep.mubr.msk.f32.mxu0 %vm3899_vm0, %v5371_v3 }
  0xa2   : > { %3354 = vmatmul.mubr.f32.gmra.mxu1 %v4112_v0 }
  0xa3   : > { %3356 = vmatprep.mubr.msk.f32.mxu1 %vm3899_vm0, %v5371_v3 }
  0xa4   : > { %3305 = vmatmul.mubr.f32.gmra.mxu0 %v4152_v44 }
  0xa5   : > { %3307 = vmatprep.mubr.msk.f32.mxu0 %vm3899_vm0, %v5371_v3 }
  0xa6   : > { %3357 = vmatmul.mubr.f32.gmra.mxu1 %v4144_v40 }
  0xa7   : > { %3359 = vmatprep.mubr.msk.f32.mxu1 %vm3899_vm0, %v5371_v3 }
  0xa8   : > { %3308 = vmatmul.mubr.f32.gmra.mxu0 %v4171_v56 }
  0xa9   : > { %3310 = vmatprep.mubr.msk.f32.mxu0 %vm3899_vm0, %v5371_v3 }
  0xaa   : > { %3360 = vmatmul.mubr.f32.gmra.mxu1 %v4152_v44 }
  0xab   : > { %3362 = vmatprep.mubr.msk.f32.mxu1 %vm3899_vm0, %v5371_v3 }
  0xac   : > { %3311 = vmatmul.mubr.f32.gmra.mxu0 %v4199_v32 }
  0xad   : > { %3313 = vmatprep.mubr.msk.f32.mxu0 %vm3899_vm0, %v5371_v3 }
  0xae   : > { %3363 = vmatmul.mubr.f32.gmra.mxu1 %v4171_v56 }
  0xaf   : > { %3365 = vmatprep.mubr.msk.f32.mxu1 %vm3899_vm0, %v5371_v3 }
  0xb0   : > { %3314 = vmatmul.mubr.f32.gmra.mxu0 %v4220_v48 }
  0xb1   : > { %3316 = vmatprep.mubr.msk.f32.mxu0 %vm3899_vm0, %v5371_v3 }
  0xb2   : > { %3366 = vmatmul.mubr.f32.gmra.mxu1 %v4199_v32 }
  0xb3   : > { %3368 = vmatprep.mubr.msk.f32.mxu1 %vm3899_vm0, %v5371_v3 }
  0xb4   : > { %3317 = vmatmul.mubr.f32.gmra.mxu0 %v4234_v62 }
  0xb5   : > { %3319 = vmatprep.mubr.msk.f32.mxu0 %vm3899_vm0, %v5371_v3 }
  0xb6   : > { %3369 = vmatmul.mubr.f32.gmra.mxu1 %v4220_v48 }
  0xb7   : > { %3371 = vmatprep.mubr.msk.f32.mxu1 %vm3899_vm0, %v5371_v3 }
  0xb8   : > { %3320 = vmatmul.mubr.f32.gmra.mxu0 %v4251_v43 }
  0xb9   : > { %3322 = vmatprep.mubr.msk.f32.mxu0 %vm3899_vm0, %v5371_v3 }
  0xba   : > { %3372 = vmatmul.mubr.f32.gmra.mxu1 %v4234_v62 }
  0xbb   : > { %3374 = vmatprep.mubr.msk.f32.mxu1 %vm3899_vm0, %v5371_v3 }
  0xbc   : > { %3323 = vmatmul.mubr.f32.gmra.mxu0 %v4278_v13 }
  0xbd   : > { %3388 = vmatprep.mubr.msk.f32.mxu0 %vm3899_vm0, %v5371_v3 }
  0xbe   : > { %3375 = vmatmul.mubr.f32.gmra.mxu1 %v4251_v43 }
  0xbf   : > { %3377 = vmatprep.mubr.msk.f32.mxu1 %vm3899_vm0, %v5371_v3 }
  0xc2   : > { %3378 = vmatmul.mubr.f32.gmra.mxu1 %v4278_v13 }
  0xc3   : > { %3435 = vmatprep.mubr.msk.f32.mxu1 %vm3899_vm0, %v5371_v3 }
  0xe3   : > { %v393_v59 = vpop.f32.mrf.mxu0 }
  0xe4   : > { %v394_v0 = vadd.f32 %v4607_v58, %v393_v59 }
  0xe5   : > { %v3068_v60 = vpop.f32.mrf.mxu0 }
  0xe7   : > { %v403_v2 = vpop.f32.mrf.mxu0 }
  0xe8   : > { %v404_v34 = vadd.f32 %v4607_v58, %v403_v2 }
  0xe9   : > { %v3071_v7 = vpop.f32.mrf.mxu0 }
  0xea   : > { %v624_v8 = vpop.f32.mrf.mxu1 }
  0xeb   : > { %v4611_v39 = vadd.f32 %v624_v8, %v394_v0 }
  0xec   : > { %v413_v40 = vpop.f32.mrf.mxu0  ;;  %v3123_v44 = vpop.f32.mrf.mxu1 }
  0xed   : > { %v414_v56 = vadd.f32 %v4607_v58, %v413_v40 }
  0xee   : > { %v3074_v53 = vpop.f32.mrf.mxu0  ;;  %v630_v54 = vpop.f32.mrf.mxu1 }
  0xef   : > { %v4614_v63 = vadd.f32 %v630_v54, %v404_v34 }
  0xf0   : > { %v423_v1 = vpop.f32.mrf.mxu0  ;;  %v3126_v14 = vpop.f32.mrf.mxu1 }
  0xf1   : > { %v424_v47 = vadd.f32 %v4607_v58, %v423_v1 }
  0xf2   : > { %v3077_v32 = vpop.f32.mrf.mxu0  ;;  %v636_v38 = vpop.f32.mrf.mxu1 }
  0xf3   : > { %v4617_v48 = vadd.f32 %v636_v38, %v414_v56 }
  0xf4   : > { %v433_v62 = vpop.f32.mrf.mxu0  ;;  %v3129_v13 = vpop.f32.mrf.mxu1 }
  0xf5   : > { %v434_v55 = vadd.f32 %v4607_v58, %v433_v62 }
  0xf6   : > { %v3080_v28 = vpop.f32.mrf.mxu0  ;;  %v642_v43 = vpop.f32.mrf.mxu1 }
  0xf7   : > { %v4620_v61 = vadd.f32 %v642_v43, %v424_v47 }
  0xf8   : > { %v443_v36 = vpop.f32.mrf.mxu0  ;;  %v3132_v45 = vpop.f32.mrf.mxu1 }
  0xf9   : > { %v444_v9 = vadd.f32 %v4607_v58, %v443_v36 }
  0xfa   : > { %v3083_v41 = vpop.f32.mrf.mxu0  ;;  %v648_v30 = vpop.f32.mrf.mxu1 }
  0xfb   : > { %v4623_v29 = vadd.f32 %v648_v30, %v434_v55 }
  0xfc   : > { %v453_v37 = vpop.f32.mrf.mxu0  ;;  %v3135_v4 = vpop.f32.mrf.mxu1 }
  0xfd   : > { %v454_v10 = vadd.f32 %v4607_v58, %v453_v37 }
  0xfe   : > { %v3086_v5 = vpop.f32.mrf.mxu0  ;;  %v654_v6 = vpop.f32.mrf.mxu1 }
  0xff   : > { %v4626_v11 = vadd.f32 %v654_v6, %v444_v9 }
 0x100   : > { %v463_v12 = vpop.f32.mrf.mxu0  ;;  %v3138_v18 = vpop.f32.mrf.mxu1 }
 0x101   : > { %v464_v24 = vadd.f32 %v4607_v58, %v463_v12 }
 0x102   : > { %v3089_v19 = vpop.f32.mrf.mxu0  ;;  %v660_v20 = vpop.f32.mrf.mxu1 }
 0x103   : > { %v4629_v25 = vadd.f32 %v660_v20, %v454_v10 }
 0x104   : > { %v473_v26 = vpop.f32.mrf.mxu0  ;;  %v3141_v35 = vpop.f32.mrf.mxu1 }
 0x105   : > { %v474_v52 = vadd.f32 %v4607_v58, %v473_v26 }
 0x106   : > { %v3092_v46 = vpop.f32.mrf.mxu0  ;;  %v666_v50 = vpop.f32.mrf.mxu1 }
 0x107   : > { %v4632_v57 = vadd.f32 %v666_v50, %v464_v24 }
 0x108   : > { %v483_v59 = vpop.f32.mrf.mxu0  ;;  %v3144_v60 = vpop.f32.mrf.mxu1 }
 0x109   : > { %v484_v7 = vadd.f32 %v4607_v58, %v483_v59 }
 0x10a   : > { %v3095_v0 = vpop.f32.mrf.mxu0  ;;  %v672_v2 = vpop.f32.mrf.mxu1 }
 0x10b   : > { %v4635_v8 = vadd.f32 %v672_v2, %v474_v52 }
 0x10c   : > { %v493_v34 = vpop.f32.mrf.mxu0  ;;  %v3147_v40 = vpop.f32.mrf.mxu1 }
 0x10d   : > { %v494_v54 = vadd.f32 %v4607_v58, %v493_v34 }
 0x10e   : > { %v3098_v44 = vpop.f32.mrf.mxu0  ;;  %v678_v53 = vpop.f32.mrf.mxu1 }
 0x10f   : > { %v4638_v56 = vadd.f32 %v678_v53, %v484_v7 }
 0x110   : > { %v503_v1 = vpop.f32.mrf.mxu0  ;;  %v3150_v14 = vpop.f32.mrf.mxu1 }
 0x111   : > { %v504_v47 = vadd.f32 %v4607_v58, %v503_v1 }
 0x112   : > { %v3101_v32 = vpop.f32.mrf.mxu0  ;;  %v684_v38 = vpop.f32.mrf.mxu1 }
 0x113   : > { %v4641_v62 = vadd.f32 %v684_v38, %v494_v54 }
 0x114   : > { %v513_v13 = vpop.f32.mrf.mxu0  ;;  %v3153_v28 = vpop.f32.mrf.mxu1 }
 0x115   : > { %v514_v36 = vadd.f32 %v4607_v58, %v513_v13 }
 0x116   : > { %v3104_v43 = vpop.f32.mrf.mxu0  ;;  %v690_v55 = vpop.f32.mrf.mxu1 }
 0x117   : > { %v4644_v45 = vadd.f32 %v690_v55, %v504_v47 }
 0x118   : > { %v3156_v41 = vpop.f32.mrf.mxu1  ;;  %v784_v30 = vpop.f32.mrf.mxu0 }
 0x11a   : > { %v696_v9 = vpop.f32.mrf.mxu1  ;;  %v3178_v37 = vpop.f32.mrf.mxu0 }
 0x11b   : > { %v4646_v4 = vadd.f32 %v696_v9, %v514_v36 }
 0x11c   : > { %v3159_v5 = vpop.f32.mrf.mxu1  ;;  %v791_v6 = vpop.f32.mrf.mxu0 }
 0x11e   : > { %v3181_v10 = vpop.f32.mrf.mxu0  ;;  %v949_v12 = vpop.f32.mrf.mxu1 }
 0x120   : > { %v798_v18 = vpop.f32.mrf.mxu0  ;;  %v3233_v19 = vpop.f32.mrf.mxu1 }
 0x122   : > { %v3184_v20 = vpop.f32.mrf.mxu0  ;;  %v957_v24 = vpop.f32.mrf.mxu1 }
 0x124   : > { %v4648_v26 = vpop.f32.mrf.mxu0  ;;  %v3236_v35 = vpop.f32.mrf.mxu1 }
 0x126   : > { %v3187_v58 = vpop.f32.mrf.mxu0  ;;  %v965_v46 = vpop.f32.mrf.mxu1 }
 0x128   : > { %v4650_v50 = vpop.f32.mrf.mxu0  ;;  %v3239_v52 = vpop.f32.mrf.mxu1 }
 0x12a   : > { %v3190_v59 = vpop.f32.mrf.mxu0  ;;  %v4652_v60 = vpop.f32.mrf.mxu1 }
 0x12c   : > { %v4654_v0 = vpop.f32.mrf.mxu0  ;;  %v3242_v2 = vpop.f32.mrf.mxu1 }
 0x12e   : > { %v3193_v7 = vpop.f32.mrf.mxu0  ;;  %v4656_v34 = vpop.f32.mrf.mxu1 }
 0x130   : > { %v4658_v40 = vpop.f32.mrf.mxu0  ;;  %v3245_v44 = vpop.f32.mrf.mxu1 }
 0x132   : > { %v3196_v53 = vpop.f32.mrf.mxu0  ;;  %v4660_v54 = vpop.f32.mrf.mxu1 }
 0x134   : > { %v4662_v1 = vpop.f32.mrf.mxu0  ;;  %v3248_v14 = vpop.f32.mrf.mxu1 }
 0x136   : > { %v3199_v32 = vpop.f32.mrf.mxu0  ;;  %v4664_v38 = vpop.f32.mrf.mxu1 }
 0x137   : > { %v785_v32 = vadd.f32 %v784_v30, %v4611_v39 }
 0x138   : > { %v4666_v47 = vpop.f32.mrf.mxu0  ;;  %v3251_v13 = vpop.f32.mrf.mxu1 }
 0x13a   : > { %v3202_v28 = vpop.f32.mrf.mxu0  ;;  %v4668_v43 = vpop.f32.mrf.mxu1 }
 0x13c   : > { %v4670_v55 = vpop.f32.mrf.mxu0  ;;  %v3254_v36 = vpop.f32.mrf.mxu1 }
 0x13d   : > { %v950_v36 = vadd.f32 %v949_v12, %v785_v32 }
 0x13e   : > { %v3205_v41 = vpop.f32.mrf.mxu0  ;;  %v4672_v9 = vpop.f32.mrf.mxu1 }
 0x140   : > { %v4674_v37 = vpop.f32.mrf.mxu0  ;;  %v3257_v5 = vpop.f32.mrf.mxu1 }
 0x142   : > { %v3208_v10 = vpop.f32.mrf.mxu0  ;;  %v4676_v19 = vpop.f32.mrf.mxu1 }
 0x143   : > { %v792_v10 = vadd.f32 %v791_v6, %v4614_v63 }
 0x144   : > { %v4678_v20 = vpop.f32.mrf.mxu0  ;;  %v3260_v35 = vpop.f32.mrf.mxu1 }
 0x145   : > { %v958_v33 = vadd.f32 %v957_v24, %v792_v10  ;;  %v813_v10 = vadd.f32 %v4650_v50, %v4623_v29 }
 0x146   : > { %v3211_v58 = vpop.f32.mrf.mxu0  ;;  %v4680_v52 = vpop.f32.mrf.mxu1 }
 0x148   : > { %v4682_v59 = vpop.f32.mrf.mxu0  ;;  %v3263_v2 = vpop.f32.mrf.mxu1 }
 0x14a   : > { %v3214_v7 = vpop.f32.mrf.mxu0  ;;  %v4684_v44 = vpop.f32.mrf.mxu1 }
 0x14c   : > { %v3266_v53 = vpop.f32.mrf.mxu1  ;;  %v1140_v14 = vpop.f32.mrf.mxu0 }
 0x14d   : > { %v1141_v35 = vadd.f32 %v1140_v14, %v950_v36  ;;  %v799_v53 = vadd.f32 %v798_v18, %v4617_v48 }
 0x14e   : > { %v4687_v13 = vpop.f32.mrf.mxu1  ;;  %v3288_v28 = vpop.f32.mrf.mxu0 }
 0x14f   : > { %v966_v28 = vadd.f32 %v965_v46, %v799_v53  ;;  %v5379_v46 = vmov 0.0  }
 0x150   : > { %v3269_v41 = vpop.f32.mrf.mxu1  ;;  %v1146_v5 = vpop.f32.mrf.mxu0 }
 0x151   : > { %v1147_v17 = vadd.f32 %v1146_v5, %v958_v33 }
 0x152   : > { %v3291_v58 = vpop.f32.mrf.mxu0  ;;  %v1291_v51 = vpop.f32.mrf.mxu1 }
 0x153   : > { %v1292_v2 = vadd.f32 %v1291_v51, %v1141_v35  ;;  %v806_v51 = vadd.f32 %v4648_v26, %v4620_v61 }
 0x154   : > { %v1152_v7 = vpop.f32.mrf.mxu0  ;;  %v3343_v23 = vpop.f32.mrf.mxu1 }
 0x155   : > { %v1367_v39 = vmax.f32 %v1292_v2, 0.0  ;;  %v1153_v24 = vadd.f32 %v1152_v7, %v966_v28  ;;  %v974_v18 = vadd.f32 %v4652_v60, %v806_v51 }
 0x156   : > { %v3294_v30 = vpop.f32.mrf.mxu0  ;;  %v1297_v3 = vpop.f32.mrf.mxu1 }
 0x157   : > { %v1393_v12 = vsel %vm1391_vm2, %v1367_v39, 0  ;;  %v1298_v32 = vadd.f32 %v1297_v3, %v1147_v17  ;;  %v982_v39 = vadd.f32 %v4656_v34, %v813_v10  ;;  %v820_v34 = vadd.f32 %v4654_v0, %v4626_v11 }
 0x158   : > { %v4692_v41 = vand.u32 4294901760, %v1393_v12  ;;  %v1158_v63 = vpop.f32.mrf.mxu0  ;;  %v3346_v6 = vpop.f32.mrf.mxu1 }
 0x159   : > { %v1368_v14 = vmax.f32 %v1298_v32, 0.0  ;;  %v1159_v60 = vadd.f32 %v1158_v63, %v974_v18  ;;  %v990_v18 = vadd.f32 %v4660_v54, %v820_v34  ;;  %v827_v54 = vadd.f32 %v4658_v40, %v4629_v25 }
 0x15a   : > { %v4697_v23 = vsub.f32 %v1393_v12, %v4692_v41  ;;  %v3297_v33 = vpop.f32.mrf.mxu0  ;;  %v1303_v48 = vpop.f32.mrf.mxu1  ;;  %3436 = vmatmul.mubr.f32.vlgmr.msra.gmra.mxu1 %v4692_v41 }
 0x15b   : > { %v1396_v3 = vsel %vm1391_vm2, %v1368_v14, 0  ;;  %v1304_v17 = vadd.f32 %v1303_v48, %v1153_v24  ;;  %3438 = vmatprep.mubr.msk.f32.mxu1 %vm3899_vm0, %v5379_v46  ;;  %3522 = vmatpush3.msra.mxu1 %v4521_v15  ;;  %v998_v25 = vadd.f32 %v4664_v38, %v827_v54  ;;  %v834_v38 = vadd.f32 %v4662_v1, %v4632_v57 }
 0x15c   : > { %v1502_v61 = vand.u32 4294901760, %v4697_v23  ;;  %v4706_v26 = vand.u32 4294901760, %v1396_v3  ;;  %v1164_v36 = vpop.f32.mrf.mxu0  ;;  %v3349_v5 = vpop.f32.mrf.mxu1  ;;  %3523 = vmatprep.subr.mxu1 %v5379_v46 }
 0x15d   : > { %v1369_v35 = vmax.f32 %v1304_v17, 0.0  ;;  %3524 = vmatpush3.msra.mxu1 %v4557_v21  ;;  %v1165_v6 = vadd.f32 %v1164_v36, %v982_v39 }
 0x15e   : > { %v1503_v58 = vsub.f32 %v4697_v23, %v1502_v61  ;;  %v4716_v2 = vsub.f32 %v1396_v3, %v4706_v26  ;;  %v3300_v7 = vpop.f32.mrf.mxu0  ;;  %v1309_v53 = vpop.f32.mrf.mxu1  ;;  %3439 = vmatmul.mubr.f32.gmra.mxu1 %v4706_v26  ;;  %3525 = vmatprep.subr.mxu1 %v5379_v46 }
 0x15f   : > { %v1399_v29 = vsel %vm1391_vm2, %v1369_v35, 0  ;;  %v1310_v50 = vadd.f32 %v1309_v53, %v1159_v60  ;;  %3441 = vmatprep.mubr.msk.f32.mxu1 %vm3899_vm0, %v5379_v46  ;;  %3526 = vmatpush3.msra.mxu1 %v4577_v27 }
 0x160   : > { %v1504_v30 = vand.u32 4294901760, %v1503_v58  ;;  %v4725_v28 = vand.u32 4294901760, %v1399_v29  ;;  %v1170_v12 = vpop.f32.mrf.mxu0  ;;  %v3352_v32 = vpop.f32.mrf.mxu1  ;;  %v1512_v63 = vand.u32 4294901760, %v4716_v2  ;;  %3527 = vmatprep.subr.mxu1 %v5379_v46 }
 0x161   : > { %v1370_v51 = vmax.f32 %v1310_v50, 0.0  ;;  %3528 = vmatpush3.msra.mxu1 %v4588_v42  ;;  %v1171_v60 = vadd.f32 %v1170_v12, %v990_v18 }
 0x162   : > { %v4733_v24 = vsub.f32 %v1399_v29, %v4725_v28  ;;  %v3303_v14 = vpop.f32.mrf.mxu0  ;;  %v1315_v33 = vpop.f32.mrf.mxu1  ;;  %3389 = vmatmul.mubr.f32.vlgmr.msra.gmra.mxu0 %v1504_v30  ;;  %3442 = vmatmul.mubr.f32.gmra.mxu1 %v4725_v28  ;;  %v1513_v48 = vsub.f32 %v4716_v2, %v1512_v63 }
 0x163   : > { %v1402_v11 = vsel %vm1391_vm2, %v1370_v51, 0  ;;  %v1316_v0 = vadd.f32 %v1315_v33, %v1165_v6  ;;  %3475 = vmatpush3.msra.mxu0 %v4528_v16  ;;  %3391 = vmatprep.mubr.msk.f32.mxu0 %vm3899_vm0, %v5379_v46 }
 0x164   : > { %v4744_v3 = vand.u32 4294901760, %v1402_v11  ;;  %v1176_v17 = vpop.f32.mrf.mxu0  ;;  %v3355_v36 = vpop.f32.mrf.mxu1  ;;  %3444 = vmatprep.mubr.msk.f32.mxu1 %vm3899_vm0, %v5379_v46  ;;  %v1514_v5 = vand.u32 4294901760, %v1513_v48  ;;  %v1522_v10 = vand.u32 4294901760, %v4733_v24  ;;  %3476 = vmatprep.subr.mxu0 %v5379_v46 }
 0x165   : > { %v1371_v35 = vmax.f32 %v1316_v0, 0.0  ;;  %3477 = vmatpush3.msra.mxu0 %v4563_v22  ;;  %3615 = vmatprep.subr.mxu1 %v5379_v46  ;;  %v1177_v6 = vadd.f32 %v1176_v17, %v998_v25 }
 0x166   : > { %v4755_v58 = vsub.f32 %v1402_v11, %v4744_v3  ;;  %v3306_v7 = vpop.f32.mrf.mxu0  ;;  %v1321_v53 = vpop.f32.mrf.mxu1  ;;  %3392 = vmatmul.mubr.f32.gmra.mxu0 %v1514_v5  ;;  %3445 = vmatmul.mubr.f32.gmra.mxu1 %v4744_v3  ;;  %v1523_v39 = vsub.f32 %v4733_v24, %v1522_v10  ;;  %v1006_v11 = vadd.f32 %v4668_v43, %v834_v38 }
 0x167   : > { %v1405_v40 = vsel %vm1391_vm2, %v1371_v35, 0  ;;  %v1322_v29 = vadd.f32 %v1321_v53, %v1171_v60  ;;  %3394 = vmatprep.mubr.msk.f32.mxu0 %vm3899_vm0, %v5379_v46  ;;  %3447 = vmatprep.mubr.msk.f32.mxu1 %vm3899_vm0, %v5379_v46  ;;  %v841_v43 = vadd.f32 %v4666_v47, %v4635_v8 }
 0x168   : > { %v4767_v50 = vand.u32 4294901760, %v1405_v40  ;;  %v1182_v30 = vpop.f32.mrf.mxu0  ;;  %v3358_v12 = vpop.f32.mrf.mxu1  ;;  %v1524_v32 = vand.u32 4294901760, %v1523_v39  ;;  %v1532_v34 = vand.u32 4294901760, %v4755_v58  ;;  %3478 = vmatprep.subr.mxu0 %v5379_v46 }
 0x169   : > { %v1372_v51 = vmax.f32 %v1322_v29, 0.0  ;;  %3479 = vmatpush3.msra.mxu0 %v4581_v31  ;;  %v1183_v60 = vadd.f32 %v1182_v30, %v1006_v11 }
 0x16a   : > { %v4775_v14 = vsub.f32 %v1405_v40, %v4767_v50  ;;  %v3309_v33 = vpop.f32.mrf.mxu0  ;;  %v1327_v48 = vpop.f32.mrf.mxu1  ;;  %3395 = vmatmul.mubr.f32.gmra.mxu0 %v1524_v32  ;;  %3448 = vmatmul.mubr.f32.gmra.mxu1 %v4767_v50  ;;  %v1533_v18 = vsub.f32 %v4755_v58, %v1532_v34  ;;  %v1014_v40 = vadd.f32 %v4672_v9, %v841_v43 }
 0x16b   : > { %v1408_v57 = vsel %vm1391_vm2, %v1372_v51, 0  ;;  %v1328_v1 = vadd.f32 %v1327_v48, %v1177_v6  ;;  %3397 = vmatprep.mubr.msk.f32.mxu0 %vm3899_vm0, %v5379_v46  ;;  %3450 = vmatprep.mubr.msk.f32.mxu1 %vm3899_vm0, %v5379_v46  ;;  %v848_v9 = vadd.f32 %v4670_v55, %v4638_v56 }
 0x16c   : > { %v4787_v0 = vand.u32 4294901760, %v1408_v57  ;;  %v1188_v17 = vpop.f32.mrf.mxu0  ;;  %v3361_v36 = vpop.f32.mrf.mxu1  ;;  %v1534_v5 = vand.u32 4294901760, %v1533_v18  ;;  %v1542_v54 = vand.u32 4294901760, %v4775_v14  ;;  %3480 = vmatprep.subr.mxu0 %v5379_v46 }
 0x16d   : > { %v1373_v35 = vmax.f32 %v1328_v1, 0.0  ;;  %3481 = vmatpush3.msra.mxu0 %v4595_v49  ;;  %v1189_v6 = vadd.f32 %v1188_v17, %v1014_v40 }
 0x16e   : > { %v4795_v7 = vsub.f32 %v1408_v57, %v4787_v0  ;;  %v3312_v53 = vpop.f32.mrf.mxu0  ;;  %v1333_v39 = vpop.f32.mrf.mxu1  ;;  %3398 = vmatmul.mubr.f32.gmra.mxu0 %v1534_v5  ;;  %3451 = vmatmul.mubr.f32.gmra.mxu1 %v4787_v0  ;;  %v1543_v25 = vsub.f32 %v4775_v14, %v1542_v54  ;;  %v1022_v57 = vadd.f32 %v4676_v19, %v848_v9 }
 0x16f   : > { %v1411_v8 = vsel %vm1391_vm2, %v1373_v35, 0  ;;  %v1334_v47 = vadd.f32 %v1333_v39, %v1183_v60  ;;  %3400 = vmatprep.mubr.msk.f32.mxu0 %vm3899_vm0, %v5379_v46  ;;  %3453 = vmatprep.mubr.msk.f32.mxu1 %vm3899_vm0, %v5379_v46  ;;  %v855_v60 = vadd.f32 %v4674_v37, %v4641_v62 }
 0x170   : > { %v4807_v29 = vand.u32 4294901760, %v1411_v8  ;;  %v1194_v30 = vpop.f32.mrf.mxu0  ;;  %v3364_v12 = vpop.f32.mrf.mxu1  ;;  %v1544_v32 = vand.u32 4294901760, %v1543_v25  ;;  %v1552_v38 = vand.u32 4294901760, %v4795_v7  ;;  %3568 = vmatprep.subr.mxu0 %v5379_v46 }
 0x171   : > { %v1374_v51 = vmax.f32 %v1334_v47, 0.0  ;;  %v1195_v19 = vadd.f32 %v1194_v30, %v1022_v57 }
 0x172   : > { %v4814_v33 = vsub.f32 %v1411_v8, %v4807_v29  ;;  %v3315_v48 = vpop.f32.mrf.mxu0  ;;  %v1339_v18 = vpop.f32.mrf.mxu1  ;;  %3401 = vmatmul.mubr.f32.gmra.mxu0 %v1544_v32  ;;  %3454 = vmatmul.mubr.f32.gmra.mxu1 %v4807_v29  ;;  %v1553_v11 = vsub.f32 %v4795_v7, %v1552_v38  ;;  %v1030_v8 = vadd.f32 %v4680_v52, %v855_v60 }
 0x173   : > { %v1414_v1 = vsel %vm1391_vm2, %v1374_v51, 0  ;;  %v1340_v36 = vadd.f32 %v1339_v18, %v1189_v6  ;;  %3403 = vmatprep.mubr.msk.f32.mxu0 %vm3899_vm0, %v5379_v46  ;;  %3456 = vmatprep.mubr.msk.f32.mxu1 %vm3899_vm0, %v5379_v46  ;;  %v862_v6 = vadd.f32 %v4678_v20, %v4644_v45 }
 0x174   : > { %v4826_v56 = vand.u32 4294901760, %v1414_v1  ;;  %v1200_v55 = vpop.f32.mrf.mxu0  ;;  %v3367_v17 = vpop.f32.mrf.mxu1  ;;  %v1554_v5 = vand.u32 4294901760, %v1553_v11  ;;  %v1562_v43 = vand.u32 4294901760, %v4814_v33 }
 0x175   : > { %v1375_v35 = vmax.f32 %v1340_v36, 0.0  ;;  %v1201_v52 = vadd.f32 %v1200_v55, %v1030_v8 }
 0x176   : > { %v4832_v53 = vsub.f32 %v1414_v1, %v4826_v56  ;;  %v3318_v39 = vpop.f32.mrf.mxu0  ;;  %v1345_v25 = vpop.f32.mrf.mxu1  ;;  %3404 = vmatmul.mubr.f32.gmra.mxu0 %v1554_v5  ;;  %3457 = vmatmul.mubr.f32.gmra.mxu1 %v4826_v56  ;;  %v1563_v40 = vsub.f32 %v4814_v33, %v1562_v43  ;;  %v1038_v1 = vadd.f32 %v4684_v44, %v862_v6 }
 0x177   : > { %v1417_v47 = vsel %vm1391_vm2, %v1375_v35, 0  ;;  %v1346_v12 = vadd.f32 %v1345_v25, %v1195_v19  ;;  %3406 = vmatprep.mubr.msk.f32.mxu0 %vm3899_vm0, %v5379_v46  ;;  %3459 = vmatprep.mubr.msk.f32.mxu1 %vm3899_vm0, %v5379_v46  ;;  %v869_v19 = vadd.f32 %v4682_v59, %v4646_v4 }
 0x178   : > { %v4844_v62 = vand.u32 4294901760, %v1417_v47  ;;  %v1206_v37 = vpop.f32.mrf.mxu0  ;;  %v3370_v30 = vpop.f32.mrf.mxu1  ;;  %v1564_v32 = vand.u32 4294901760, %v1563_v40  ;;  %v1572_v9 = vand.u32 4294901760, %v4832_v53 }
 0x179   : > { %v1376_v51 = vmax.f32 %v1346_v12, 0.0  ;;  %v1207_v44 = vadd.f32 %v1206_v37, %v1038_v1 }
 0x17a   : > { %v4850_v48 = vsub.f32 %v1417_v47, %v4844_v62  ;;  %v3321_v18 = vpop.f32.mrf.mxu0  ;;  %v1351_v11 = vpop.f32.mrf.mxu1  ;;  %3407 = vmatmul.mubr.f32.gmra.mxu0 %v1564_v32  ;;  %3460 = vmatmul.mubr.f32.gmra.mxu1 %v4844_v62  ;;  %v1573_v57 = vsub.f32 %v4832_v53, %v1572_v9  ;;  %v1046_v47 = vadd.f32 %v4687_v13, %v869_v19 }
 0x17b   : > { %v1420_v36 = vsel %vm1391_vm2, %v1376_v51, 0  ;;  %v1352_v17 = vadd.f32 %v1351_v11, %v1201_v52  ;;  %3409 = vmatprep.mubr.msk.f32.mxu0 %vm3899_vm0, %v5379_v46  ;;  %3462 = vmatprep.mubr.msk.f32.mxu1 %vm3899_vm0, %v5379_v46 }
 0x17c   : > { %v4862_v45 = vand.u32 4294901760, %v1420_v36  ;;  %v1212_v20 = vpop.f32.mrf.mxu0  ;;  %v3373_v55 = vpop.f32.mrf.mxu1  ;;  %v1574_v5 = vand.u32 4294901760, %v1573_v57  ;;  %v1582_v60 = vand.u32 4294901760, %v4850_v48 }
 0x17d   : > { %v1377_v35 = vmax.f32 %v1352_v17, 0.0  ;;  %v1213_v6 = vadd.f32 %v1212_v20, %v1046_v47 }
 0x17e   : > { %v4868_v39 = vsub.f32 %v1420_v36, %v4862_v45  ;;  %v1357_v25 = vpop.f32.mrf.mxu1  ;;  %3410 = vmatmul.mubr.f32.gmra.mxu0 %v1574_v5  ;;  %3463 = vmatmul.mubr.f32.gmra.mxu1 %v4862_v45  ;;  %v3324_v40 = vpop.f32.mrf.mxu0  ;;  %v1583_v8 = vsub.f32 %v4850_v48, %v1582_v60 }
 0x17f   : > { %v1423_v12 = vsel %vm1391_vm2, %v1377_v35, 0  ;;  %v1358_v30 = vadd.f32 %v1357_v25, %v1207_v44  ;;  %3412 = vmatprep.mubr.msk.f32.mxu0 %vm3899_vm0, %v5379_v46  ;;  %3465 = vmatprep.mubr.msk.f32.mxu1 %vm3899_vm0, %v5379_v46 }
 0x180   : > { %v4880_v4 = vand.u32 4294901760, %v1423_v12  ;;  %v3376_v59 = vpop.f32.mrf.mxu1  ;;  %v1584_v37 = vand.u32 4294901760, %v1583_v8  ;;  %v1592_v32 = vand.u32 4294901760, %v4868_v39 }
 0x181   : > { %v1378_v52 = vmax.f32 %v1358_v30, 0.0 }
 0x182   : > { %v4884_v51 = vsub.f32 %v1423_v12, %v4880_v4  ;;  %v1363_v13 = vpop.f32.mrf.mxu1  ;;  %3413 = vmatmul.mubr.f32.gmra.mxu0 %v1584_v37  ;;  %3466 = vmatmul.mubr.f32.gmra.mxu1 %v4880_v4  ;;  %v1593_v18 = vsub.f32 %v4868_v39, %v1592_v32 }
 0x183   : > { %v1426_v11 = vsel %vm1391_vm2, %v1378_v52, 0  ;;  %v1364_v57 = vadd.f32 %v1363_v13, %v1213_v6  ;;  %3415 = vmatprep.mubr.msk.f32.mxu0 %vm3899_vm0, %v5379_v46  ;;  %3468 = vmatprep.mubr.msk.f32.mxu1 %vm3899_vm0, %v5379_v46 }
 0x184   : > { %v4895_v1 = vand.u32 4294901760, %v1426_v11  ;;  %v3379_v36 = vpop.f32.mrf.mxu1  ;;  %v1594_v17 = vand.u32 4294901760, %v1593_v18  ;;  %v1602_v20 = vand.u32 4294901760, %v4884_v51 }
 0x185   : > { %v1379_v55 = vmax.f32 %v1364_v57, 0.0 }
 0x186   : > { %v4899_v5 = vsub.f32 %v1426_v11, %v4895_v1  ;;  %3416 = vmatmul.mubr.f32.gmra.mxu0 %v1594_v17  ;;  %3469 = vmatmul.mubr.f32.gmra.mxu1 %v4895_v1  ;;  %v1603_v19 = vsub.f32 %v4884_v51, %v1602_v20 }
 0x187   : > { %v1429_v44 = vsel %vm1391_vm2, %v1379_v55, 0  ;;  %3418 = vmatprep.mubr.msk.f32.mxu0 %vm3899_vm0, %v5379_v46  ;;  %3471 = vmatprep.mubr.msk.f32.mxu1 %vm3899_vm0, %v5379_v46 }
 0x188   : > { %v4910_v35 = vand.u32 4294901760, %v1429_v44  ;;  %v1604_v25 = vand.u32 4294901760, %v1603_v19  ;;  %v1612_v40 = vand.u32 4294901760, %v4899_v5 }
 0x18a   : > { %v4914_v8 = vsub.f32 %v1429_v44, %v4910_v35  ;;  %3419 = vmatmul.mubr.f32.gmra.mxu0 %v1604_v25  ;;  %3472 = vmatmul.mubr.f32.gmra.mxu1 %v4910_v35  ;;  %v1613_v47 = vsub.f32 %v4899_v5, %v1612_v40 }
 0x18b   : > { %3421 = vmatprep.mubr.msk.f32.mxu0 %vm3899_vm0, %v5379_v46  ;;  %3529 = vmatprep.mubr.msk.f32.mxu1 %vm3899_vm0, %v5379_v46 }
 0x18c   : > { %v1614_v12 = vand.u32 4294901760, %v1613_v47  ;;  %v1622_v30 = vand.u32 4294901760, %v4914_v8 }
 0x18e   : > { %3422 = vmatmul.mubr.f32.gmra.mxu0 %v1614_v12  ;;  %3530 = vmatmul.mubr.f32.vlgmr.msra.gmra.mxu1 %v1502_v61  ;;  %v1623_v59 = vsub.f32 %v4914_v8, %v1622_v30 }
 0x18f   : > { %3424 = vmatprep.mubr.msk.f32.mxu0 %vm3899_vm0, %v5379_v46  ;;  %3532 = vmatprep.mubr.msk.f32.mxu1 %vm3899_vm0, %v5379_v46 }
 0x190   : > { %v1624_v37 = vand.u32 4294901760, %v1623_v59  ;;  %3616 = vmatpush3.msra.mxu1 %v4521_v15  ;;  %v5380_v15 = vand.u32 4294901760, %v4528_v16  ;;  %v5382_v16 = vand.u32 4294901760, %v4581_v31 }
 0x191   : > { %3617 = vmatprep.subr.mxu1 %v5379_v46 }
 0x192   : > { %3425 = vmatmul.mubr.f32.gmra.mxu0 %v1624_v37  ;;  %3533 = vmatmul.mubr.f32.gmra.mxu1 %v1512_v63 }
 0x193   : > { %3482 = vmatprep.mubr.msk.f32.mxu0 %vm3899_vm0, %v5379_v46  ;;  %3535 = vmatprep.mubr.msk.f32.mxu1 %vm3899_vm0, %v5379_v46 }
 0x194   : > { %3618 = vmatpush3.msra.mxu1 %v4557_v21  ;;  %v5381_v21 = vand.u32 4294901760, %v4563_v22  ;;  %v5383_v22 = vand.u32 4294901760, %v4595_v49 }
 0x195   : > { %3619 = vmatprep.subr.mxu1 %v5379_v46 }
 0x196   : > { %3483 = vmatmul.mubr.f32.vlgmr.msra.gmra.mxu0 %v4697_v23  ;;  %3536 = vmatmul.mubr.f32.gmra.mxu1 %v1522_v10 }
 0x197   : > { %3569 = vmatpush3.msra.mxu0 %v5380_v15  ;;  %3485 = vmatprep.mubr.msk.f32.mxu0 %vm3899_vm0, %v5379_v46 }
 0x198   : > { %3538 = vmatprep.mubr.msk.f32.mxu1 %vm3899_vm0, %v5379_v46  ;;  %3570 = vmatprep.subr.mxu0 %v5379_v46 }
 0x199   : > { %3571 = vmatpush3.msra.mxu0 %v5381_v21  ;;  %3620 = vmatpush3.msra.mxu1 %v4577_v27 }
 0x19a   : > { %3486 = vmatmul.mubr.f32.gmra.mxu0 %v4716_v2  ;;  %3539 = vmatmul.mubr.f32.gmra.mxu1 %v1532_v34 }
 0x19b   : > { %3488 = vmatprep.mubr.msk.f32.mxu0 %vm3899_vm0, %v5379_v46  ;;  %3541 = vmatprep.mubr.msk.f32.mxu1 %vm3899_vm0, %v5379_v46 }
 0x19c   : > { %3572 = vmatprep.subr.mxu0 %v5379_v46  ;;  %3621 = vmatprep.subr.mxu1 %v5379_v46 }
 0x19d   : > { %3573 = vmatpush3.msra.mxu0 %v5382_v16  ;;  %3622 = vmatpush3.msra.mxu1 %v4588_v42 }
 0x19e   : > { %3489 = vmatmul.mubr.f32.gmra.mxu0 %v4733_v24  ;;  %3542 = vmatmul.mubr.f32.gmra.mxu1 %v1542_v54 }
 0x19f   : > { %3491 = vmatprep.mubr.msk.f32.mxu0 %vm3899_vm0, %v5379_v46  ;;  %3544 = vmatprep.mubr.msk.f32.mxu1 %vm3899_vm0, %v5379_v46 }
 0x1a0   : > { %3574 = vmatprep.subr.mxu0 %v5379_v46 }
 0x1a1   : > { %3575 = vmatpush3.msra.mxu0 %v5383_v22 }
 0x1a2   : > { %3492 = vmatmul.mubr.f32.gmra.mxu0 %v4755_v58  ;;  %3545 = vmatmul.mubr.f32.gmra.mxu1 %v1552_v38 }
 0x1a3   : > { %3494 = vmatprep.mubr.msk.f32.mxu0 %vm3899_vm0, %v5379_v46  ;;  %3547 = vmatprep.mubr.msk.f32.mxu1 %vm3899_vm0, %v5379_v46 }
 0x1a6   : > { %3495 = vmatmul.mubr.f32.gmra.mxu0 %v4775_v14  ;;  %3548 = vmatmul.mubr.f32.gmra.mxu1 %v1562_v43 }
 0x1a7   : > { %3497 = vmatprep.mubr.msk.f32.mxu0 %vm3899_vm0, %v5379_v46  ;;  %3550 = vmatprep.mubr.msk.f32.mxu1 %vm3899_vm0, %v5379_v46 }
 0x1aa   : > { %3498 = vmatmul.mubr.f32.gmra.mxu0 %v4795_v7  ;;  %3551 = vmatmul.mubr.f32.gmra.mxu1 %v1572_v9 }
 0x1ab   : > { %3500 = vmatprep.mubr.msk.f32.mxu0 %vm3899_vm0, %v5379_v46  ;;  %3553 = vmatprep.mubr.msk.f32.mxu1 %vm3899_vm0, %v5379_v46 }
 0x1ae   : > { %3501 = vmatmul.mubr.f32.gmra.mxu0 %v4814_v33  ;;  %3554 = vmatmul.mubr.f32.gmra.mxu1 %v1582_v60 }
 0x1af   : > { %3503 = vmatprep.mubr.msk.f32.mxu0 %vm3899_vm0, %v5379_v46  ;;  %3556 = vmatprep.mubr.msk.f32.mxu1 %vm3899_vm0, %v5379_v46 }
 0x1b2   : > { %3504 = vmatmul.mubr.f32.gmra.mxu0 %v4832_v53  ;;  %3557 = vmatmul.mubr.f32.gmra.mxu1 %v1592_v32 }
 0x1b3   : > { %3506 = vmatprep.mubr.msk.f32.mxu0 %vm3899_vm0, %v5379_v46  ;;  %3559 = vmatprep.mubr.msk.f32.mxu1 %vm3899_vm0, %v5379_v46 }
 0x1b6   : > { %3507 = vmatmul.mubr.f32.gmra.mxu0 %v4850_v48  ;;  %3560 = vmatmul.mubr.f32.gmra.mxu1 %v1602_v20 }
 0x1b7   : > { %3509 = vmatprep.mubr.msk.f32.mxu0 %vm3899_vm0, %v5379_v46  ;;  %3562 = vmatprep.mubr.msk.f32.mxu1 %vm3899_vm0, %v5379_v46 }
 0x1ba   : > { %3510 = vmatmul.mubr.f32.gmra.mxu0 %v4868_v39  ;;  %3563 = vmatmul.mubr.f32.gmra.mxu1 %v1612_v40 }
 0x1bb   : > { %3512 = vmatprep.mubr.msk.f32.mxu0 %vm3899_vm0, %v5379_v46  ;;  %3565 = vmatprep.mubr.msk.f32.mxu1 %vm3899_vm0, %v5379_v46 }
 0x1be   : > { %3513 = vmatmul.mubr.f32.gmra.mxu0 %v4884_v51  ;;  %3566 = vmatmul.mubr.f32.gmra.mxu1 %v1622_v30 }
 0x1bf   : > { %3515 = vmatprep.mubr.msk.f32.mxu0 %vm3899_vm0, %v5379_v46  ;;  %3623 = vmatprep.mubr.msk.f32.mxu1 %vm3899_vm0, %v5379_v46 }
 0x1c2   : > { %3516 = vmatmul.mubr.f32.gmra.mxu0 %v4899_v5  ;;  %3624 = vmatmul.mubr.f32.vlgmr.msra.gmra.mxu1 %v4692_v41 }
 0x1c3   : > { %3518 = vmatprep.mubr.msk.f32.mxu0 %vm3899_vm0, %v5379_v46  ;;  %3626 = vmatprep.mubr.msk.f32.mxu1 %vm3899_vm0, %v5379_v46 }
 0x1c6   : > { %3519 = vmatmul.mubr.f32.gmra.mxu0 %v4914_v8  ;;  %3627 = vmatmul.mubr.f32.gmra.mxu1 %v4706_v26 }
 0x1c7   : > { %3576 = vmatprep.mubr.msk.f32.mxu0 %vm3899_vm0, %v5379_v46  ;;  %3629 = vmatprep.mubr.msk.f32.mxu1 %vm3899_vm0, %v5379_v46 }
 0x1ca   : > { %3577 = vmatmul.mubr.f32.vlgmr.msra.gmra.mxu0 %v4692_v41  ;;  %3630 = vmatmul.mubr.f32.gmra.mxu1 %v4725_v28  ;;  %v5118_v41 = vld [vmem:[%s5360_s4] ss:$0 sm:$0xff] }
 0x1cb   : > { %3579 = vmatprep.mubr.msk.f32.mxu0 %vm3899_vm0, %v5379_v46  ;;  %3632 = vmatprep.mubr.msk.f32.mxu1 %vm3899_vm0, %v5379_v46 }
 0x1ce   : > { %3580 = vmatmul.mubr.f32.gmra.mxu0 %v4706_v26  ;;  %3633 = vmatmul.mubr.f32.gmra.mxu1 %v4744_v3 }
 0x1cf   : > { %3582 = vmatprep.mubr.msk.f32.mxu0 %vm3899_vm0, %v5379_v46  ;;  %3635 = vmatprep.mubr.msk.f32.mxu1 %vm3899_vm0, %v5379_v46 }
 0x1d2   : > { %3583 = vmatmul.mubr.f32.gmra.mxu0 %v4725_v28  ;;  %3636 = vmatmul.mubr.f32.gmra.mxu1 %v4767_v50 }
 0x1d3   : > { %3585 = vmatprep.mubr.msk.f32.mxu0 %vm3899_vm0, %v5379_v46  ;;  %3638 = vmatprep.mubr.msk.f32.mxu1 %vm3899_vm0, %v5379_v46 }
 0x1d6   : > { %3586 = vmatmul.mubr.f32.gmra.mxu0 %v4744_v3  ;;  %3639 = vmatmul.mubr.f32.gmra.mxu1 %v4787_v0 }
 0x1d7   : > { %3588 = vmatprep.mubr.msk.f32.mxu0 %vm3899_vm0, %v5379_v46  ;;  %3641 = vmatprep.mubr.msk.f32.mxu1 %vm3899_vm0, %v5379_v46 }
 0x1da   : > { %3589 = vmatmul.mubr.f32.gmra.mxu0 %v4767_v50  ;;  %3642 = vmatmul.mubr.f32.gmra.mxu1 %v4807_v29 }
 0x1db   : > { %3591 = vmatprep.mubr.msk.f32.mxu0 %vm3899_vm0, %v5379_v46  ;;  %3644 = vmatprep.mubr.msk.f32.mxu1 %vm3899_vm0, %v5379_v46 }
 0x1de   : > { %3592 = vmatmul.mubr.f32.gmra.mxu0 %v4787_v0  ;;  %3645 = vmatmul.mubr.f32.gmra.mxu1 %v4826_v56 }
 0x1df   : > { %3594 = vmatprep.mubr.msk.f32.mxu0 %vm3899_vm0, %v5379_v46  ;;  %3647 = vmatprep.mubr.msk.f32.mxu1 %vm3899_vm0, %v5379_v46 }
 0x1e2   : > { %3595 = vmatmul.mubr.f32.gmra.mxu0 %v4807_v29  ;;  %3648 = vmatmul.mubr.f32.gmra.mxu1 %v4844_v62 }
 0x1e3   : > { %3597 = vmatprep.mubr.msk.f32.mxu0 %vm3899_vm0, %v5379_v46  ;;  %3650 = vmatprep.mubr.msk.f32.mxu1 %vm3899_vm0, %v5379_v46 }
 0x1e6   : > { %3598 = vmatmul.mubr.f32.gmra.mxu0 %v4826_v56  ;;  %3651 = vmatmul.mubr.f32.gmra.mxu1 %v4862_v45 }
 0x1e7   : > { %3600 = vmatprep.mubr.msk.f32.mxu0 %vm3899_vm0, %v5379_v46  ;;  %3653 = vmatprep.mubr.msk.f32.mxu1 %vm3899_vm0, %v5379_v46 }
 0x1ea   : > { %3601 = vmatmul.mubr.f32.gmra.mxu0 %v4844_v62  ;;  %3654 = vmatmul.mubr.f32.gmra.mxu1 %v4880_v4 }
 0x1eb   : > { %3603 = vmatprep.mubr.msk.f32.mxu0 %vm3899_vm0, %v5379_v46  ;;  %3656 = vmatprep.mubr.msk.f32.mxu1 %vm3899_vm0, %v5379_v46 }
 0x1ee   : > { %3604 = vmatmul.mubr.f32.gmra.mxu0 %v4862_v45  ;;  %3657 = vmatmul.mubr.f32.gmra.mxu1 %v4895_v1 }
 0x1ef   : > { %3606 = vmatprep.mubr.msk.f32.mxu0 %vm3899_vm0, %v5379_v46  ;;  %3659 = vmatprep.mubr.msk.f32.mxu1 %vm3899_vm0, %v5379_v46 }
 0x1f2   : > { %3607 = vmatmul.mubr.f32.gmra.mxu0 %v4880_v4  ;;  %3660 = vmatmul.mubr.f32.gmra.mxu1 %v4910_v35 }
 0x1f3   : > { %3609 = vmatprep.mubr.msk.f32.mxu0 %vm3899_vm0, %v5379_v46 }
 0x1f6   : > { %3610 = vmatmul.mubr.f32.gmra.mxu0 %v4895_v1 }
 0x1f7   : > { %3612 = vmatprep.mubr.msk.f32.mxu0 %vm3899_vm0, %v5379_v46 }
 0x1fa   : > { %3613 = vmatmul.mubr.f32.gmra.mxu0 %v4910_v35 }
 0x21a   : > { %v1717_v27 = vpop.f32.mrf.mxu1 }
 0x21c   : > { %v3437_v31 = vpop.f32.mrf.mxu1 }
 0x21e   : > { %v1723_v42 = vpop.f32.mrf.mxu1 }
 0x220   : > { %v3440_v49 = vpop.f32.mrf.mxu1 }
 0x222   : > { %v1506_v23 = vpop.f32.mrf.mxu0  ;;  %v1729_v61 = vpop.f32.mrf.mxu1 }
 0x223   : > { %v1507_v26 = vadd.f32 %v5118_v41, %v1506_v23 }
 0x224   : > { %v3390_v2 = vpop.f32.mrf.mxu0  ;;  %v3443_v28 = vpop.f32.mrf.mxu1 }
 0x225   : > { %v5121_v63 = vadd.f32 %v1717_v27, %v1507_v26 }
 0x226   : > { %v1516_v46 = vpop.f32.mrf.mxu0  ;;  %v1735_v24 = vpop.f32.mrf.mxu1 }
 0x227   : > { %v1517_v3 = vadd.f32 %v5118_v41, %v1516_v46 }
 0x228   : > { %v3393_v10 = vpop.f32.mrf.mxu0  ;;  %v3446_v58 = vpop.f32.mrf.mxu1 }
 0x229   : > { %v5124_v50 = vadd.f32 %v1723_v42, %v1517_v3 }
 0x22a   : > { %v1526_v34 = vpop.f32.mrf.mxu0  ;;  %v1741_v14 = vpop.f32.mrf.mxu1 }
 0x22b   : > { %v1527_v0 = vadd.f32 %v5118_v41, %v1526_v34 }
 0x22c   : > { %v3396_v54 = vpop.f32.mrf.mxu0  ;;  %v3449_v7 = vpop.f32.mrf.mxu1 }
 0x22d   : > { %v5127_v29 = vadd.f32 %v1729_v61, %v1527_v0 }
 0x22e   : > { %v1536_v38 = vpop.f32.mrf.mxu0  ;;  %v1747_v33 = vpop.f32.mrf.mxu1 }
 0x22f   : > { %v1537_v56 = vadd.f32 %v5118_v41, %v1536_v38 }
 0x230   : > { %v3399_v43 = vpop.f32.mrf.mxu0  ;;  %v3452_v53 = vpop.f32.mrf.mxu1 }
 0x231   : > { %v5130_v62 = vadd.f32 %v1735_v24, %v1537_v56 }
 0x232   : > { %v1546_v9 = vpop.f32.mrf.mxu0  ;;  %v1753_v48 = vpop.f32.mrf.mxu1 }
 0x233   : > { %v1547_v45 = vadd.f32 %v5118_v41, %v1546_v9 }
 0x234   : > { %v3402_v60 = vpop.f32.mrf.mxu0  ;;  %v3455_v39 = vpop.f32.mrf.mxu1 }
 0x235   : > { %v5133_v4 = vadd.f32 %v1741_v14, %v1547_v45 }
 0x236   : > { %v1556_v32 = vpop.f32.mrf.mxu0  ;;  %v1759_v6 = vpop.f32.mrf.mxu1 }
 0x237   : > { %v1557_v52 = vadd.f32 %v5118_v41, %v1556_v32 }
 0x238   : > { %v3405_v51 = vpop.f32.mrf.mxu0  ;;  %v3458_v13 = vpop.f32.mrf.mxu1 }
 0x239   : > { %v5136_v18 = vadd.f32 %v1747_v33, %v1557_v52 }
 0x23a   : > { %v1566_v11 = vpop.f32.mrf.mxu0  ;;  %v1765_v57 = vpop.f32.mrf.mxu1 }
 0x23b   : > { %v1567_v1 = vadd.f32 %v5118_v41, %v1566_v11 }
 0x23c   : > { %v3408_v36 = vpop.f32.mrf.mxu0  ;;  %v3461_v17 = vpop.f32.mrf.mxu1 }
 0x23d   : > { %v5139_v20 = vadd.f32 %v1753_v48, %v1567_v1 }
 0x23e   : > { %v1576_v55 = vpop.f32.mrf.mxu0  ;;  %v1771_v5 = vpop.f32.mrf.mxu1 }
 0x23f   : > { %v1577_v19 = vadd.f32 %v5118_v41, %v1576_v55 }
 0x240   : > { %v3411_v44 = vpop.f32.mrf.mxu0  ;;  %v3464_v35 = vpop.f32.mrf.mxu1 }
 0x241   : > { %v5142_v25 = vadd.f32 %v1759_v6, %v1577_v19 }
 0x242   : > { %v1586_v40 = vpop.f32.mrf.mxu0  ;;  %v1777_v8 = vpop.f32.mrf.mxu1 }
 0x243   : > { %v1587_v47 = vadd.f32 %v5118_v41, %v1586_v40 }
 0x244   : > { %v3414_v12 = vpop.f32.mrf.mxu0  ;;  %v3467_v30 = vpop.f32.mrf.mxu1 }
 0x245   : > { %v5145_v59 = vadd.f32 %v1765_v57, %v1587_v47 }
 0x246   : > { %v1596_v37 = vpop.f32.mrf.mxu0  ;;  %v1783_v15 = vpop.f32.mrf.mxu1 }
 0x247   : > { %v1597_v21 = vadd.f32 %v5118_v41, %v1596_v37 }
 0x248   : > { %v3417_v16 = vpop.f32.mrf.mxu0  ;;  %v3470_v22 = vpop.f32.mrf.mxu1 }
 0x249   : > { %v5148_v27 = vadd.f32 %v1771_v5, %v1597_v21 }
 0x24a   : > { %v1606_v31 = vpop.f32.mrf.mxu0  ;;  %v1789_v42 = vpop.f32.mrf.mxu1 }
 0x24b   : > { %v1607_v49 = vadd.f32 %v5118_v41, %v1606_v31 }
 0x24c   : > { %v3420_v23 = vpop.f32.mrf.mxu0  ;;  %v3473_v61 = vpop.f32.mrf.mxu1 }
 0x24d   : > { %v5151_v26 = vadd.f32 %v1777_v8, %v1607_v49 }
 0x24e   : > { %v1616_v2 = vpop.f32.mrf.mxu0  ;;  %v5153_v28 = vpop.f32.mrf.mxu1 }
 0x24f   : > { %v1617_v46 = vadd.f32 %v5118_v41, %v1616_v2 }
 0x250   : > { %v3423_v24 = vpop.f32.mrf.mxu0  ;;  %v3531_v3 = vpop.f32.mrf.mxu1 }
 0x251   : > { %v5156_v10 = vadd.f32 %v1783_v15, %v1617_v46 }
 0x252   : > { %v1626_v58 = vpop.f32.mrf.mxu0  ;;  %v5158_v34 = vpop.f32.mrf.mxu1 }
 0x253   : > { %v1627_v14 = vadd.f32 %v5118_v41, %v1626_v58 }
 0x254   : > { %v3426_v0 = vpop.f32.mrf.mxu0  ;;  %v3534_v54 = vpop.f32.mrf.mxu1 }
 0x255   : > { %v5161_v7 = vadd.f32 %v1789_v42, %v1627_v14 }
 0x256   : > { %v1869_v38 = vpop.f32.mrf.mxu0  ;;  %v5163_v33 = vpop.f32.mrf.mxu1 }
 0x257   : > { %v1870_v54 = vadd.f32 %v1869_v38, %v5121_v63 }
 0x258   : > { %v3484_v56 = vpop.f32.mrf.mxu0  ;;  %v3537_v43 = vpop.f32.mrf.mxu1 }
 0x25a   : > { %v1876_v53 = vpop.f32.mrf.mxu0  ;;  %v5165_v9 = vpop.f32.mrf.mxu1 }
 0x25c   : > { %v3487_v48 = vpop.f32.mrf.mxu0  ;;  %v3540_v45 = vpop.f32.mrf.mxu1 }
 0x25e   : > { %v1883_v60 = vpop.f32.mrf.mxu0  ;;  %v5167_v39 = vpop.f32.mrf.mxu1 }
 0x260   : > { %v3490_v32 = vpop.f32.mrf.mxu0  ;;  %v3543_v6 = vpop.f32.mrf.mxu1 }
 0x261   : > { %v1877_v32 = vadd.f32 %v1876_v53, %v5124_v50  ;;  %v2031_v6 = vadd.f32 %v5153_v28, %v1870_v54 }
 0x262   : > { %v1890_v41 = vpop.f32.mrf.mxu0  ;;  %v5169_v52 = vpop.f32.mrf.mxu1 }
 0x263   : > { %v1891_v50 = vadd.f32 %v1890_v41, %v5130_v62 }
 0x264   : > { %v3493_v51 = vpop.f32.mrf.mxu0  ;;  %v3546_v13 = vpop.f32.mrf.mxu1 }
 0x266   : > { %v5171_v11 = vpop.f32.mrf.mxu0  ;;  %v5173_v57 = vpop.f32.mrf.mxu1 }
 0x268   : > { %v3496_v1 = vpop.f32.mrf.mxu0  ;;  %v3549_v36 = vpop.f32.mrf.mxu1 }
 0x26a   : > { %v5175_v17 = vpop.f32.mrf.mxu0  ;;  %v5177_v55 = vpop.f32.mrf.mxu1 }
 0x26c   : > { %v3499_v5 = vpop.f32.mrf.mxu0  ;;  %v3552_v19 = vpop.f32.mrf.mxu1 }
 0x26d   : > { %v1884_v19 = vadd.f32 %v1883_v60, %v5127_v29 }
 0x26e   : > { %v5179_v44 = vpop.f32.mrf.mxu0  ;;  %v5181_v35 = vpop.f32.mrf.mxu1 }
 0x26f   : > { %v2047_v53 = vadd.f32 %v5163_v33, %v1884_v19  ;;  %v1905_v33 = vadd.f32 %v5175_v17, %v5136_v18 }
 0x270   : > { %v3502_v40 = vpop.f32.mrf.mxu0  ;;  %v3555_v8 = vpop.f32.mrf.mxu1 }
 0x271   : > { %v2039_v8 = vadd.f32 %v5158_v34, %v1877_v32  ;;  %v1898_v34 = vadd.f32 %v5171_v11, %v5133_v4 }
 0x272   : > { %v5183_v47 = vpop.f32.mrf.mxu0  ;;  %v5185_v12 = vpop.f32.mrf.mxu1 }
 0x273   : > { %v2063_v32 = vadd.f32 %v5167_v39, %v1898_v34 }
 0x274   : > { %v3505_v30 = vpop.f32.mrf.mxu0  ;;  %v3558_v37 = vpop.f32.mrf.mxu1 }
 0x276   : > { %v5187_v15 = vpop.f32.mrf.mxu0  ;;  %v5189_v21 = vpop.f32.mrf.mxu1 }
 0x278   : > { %v3508_v16 = vpop.f32.mrf.mxu0  ;;  %v3561_v22 = vpop.f32.mrf.mxu1 }
 0x27a   : > { %v5191_v31 = vpop.f32.mrf.mxu0  ;;  %v5193_v42 = vpop.f32.mrf.mxu1 }
 0x27c   : > { %v3511_v49 = vpop.f32.mrf.mxu0  ;;  %v3564_v23 = vpop.f32.mrf.mxu1 }
 0x27e   : > { %v5195_v61 = vpop.f32.mrf.mxu0  ;;  %v5197_v2 = vpop.f32.mrf.mxu1 }
 0x280   : > { %v3514_v46 = vpop.f32.mrf.mxu0  ;;  %v3567_v24 = vpop.f32.mrf.mxu1 }
 0x282   : > { %v5199_v3 = vpop.f32.mrf.mxu0  ;;  %v2356_v58 = vpop.f32.mrf.mxu1 }
 0x284   : > { %v3517_v14 = vpop.f32.mrf.mxu0  ;;  %v3625_v0 = vpop.f32.mrf.mxu1 }
 0x285   : > { %v2055_v14 = vadd.f32 %v5165_v9, %v1891_v50  ;;  %v1912_v9 = vadd.f32 %v5179_v44, %v5139_v20 }
 0x286   : > { %v5202_v56 = vpop.f32.mrf.mxu0  ;;  %v2362_v43 = vpop.f32.mrf.mxu1 }
 0x287   : > { %v2079_v20 = vadd.f32 %v5173_v57, %v1912_v9 }
 0x288   : > { %v3520_v48 = vpop.f32.mrf.mxu0  ;;  %v3628_v45 = vpop.f32.mrf.mxu1 }
 0x28a   : > { %v2209_v51 = vpop.f32.mrf.mxu0  ;;  %v2368_v13 = vpop.f32.mrf.mxu1 }
 0x28b   : > { %v2210_v1 = vadd.f32 %v2209_v51, %v2031_v6 }
 0x28c   : > { %v3578_v36 = vpop.f32.mrf.mxu0  ;;  %v3631_v5 = vpop.f32.mrf.mxu1 }
 0x28d   : > { %v2357_v40 = vadd.f32 %v2356_v58, %v2210_v1  ;;  %v2071_v5 = vadd.f32 %v5169_v52, %v1905_v33 }
 0x28e   : > { %v2215_v63 = vpop.f32.mrf.mxu0  ;;  %v2374_v38 = vpop.f32.mrf.mxu1 }
 0x28f   : > { %v2796_v30 = vmul.f32 -1.442695, %v2357_v40  ;;  %v2216_v37 = vadd.f32 %v2215_v63, %v2039_v8 }
 0x290   : > { %v3581_v16 = vpop.f32.mrf.mxu0  ;;  %v3634_v22 = vpop.f32.mrf.mxu1 }
 0x291   : > { %3754 = vpow2.f32 %v2796_v30  ;;  %v2363_v28 = vadd.f32 %v2362_v43, %v2216_v37  ;;  %v1919_v30 = vadd.f32 %v5183_v47, %v5142_v25 }
 0x292   : > { %v2221_v49 = vpop.f32.mrf.mxu0  ;;  %v2380_v23 = vpop.f32.mrf.mxu1 }
 0x293   : > { %v2797_v46 = vmul.f32 -1.442695, %v2363_v28  ;;  %v2222_v24 = vadd.f32 %v2221_v49, %v2047_v53  ;;  %v2087_v25 = vadd.f32 %v5177_v55, %v1919_v30 }
 0x294   : > { %v3584_v29 = vpop.f32.mrf.mxu0  ;;  %v3637_v60 = vpop.f32.mrf.mxu1 }
 0x295   : > { %3756 = vpow2.f32 %v2797_v46  ;;  %v2369_v58 = vadd.f32 %v2368_v13, %v2222_v24 }
 0x296   : > { %v2227_v0 = vpop.f32.mrf.mxu0  ;;  %v2386_v54 = vpop.f32.mrf.mxu1 }
 0x297   : > { %v2798_v62 = vmul.f32 -1.442695, %v2369_v58  ;;  %v2228_v41 = vadd.f32 %v2227_v0, %v2055_v14  ;;  %v1933_v0 = vadd.f32 %v5191_v31, %v5148_v27 }
 0x298   : > { %v3587_v43 = vpop.f32.mrf.mxu0  ;;  %v3640_v48 = vpop.f32.mrf.mxu1 }
 0x299   : > { %3758 = vpow2.f32 %v2798_v62  ;;  %v2375_v45 = vadd.f32 %v2374_v38, %v2228_v41  ;;  %v2103_v27 = vadd.f32 %v5185_v12, %v1933_v0 }
 0x29a   : > { %v2233_v6 = vpop.f32.mrf.mxu0  ;;  %v2392_v51 = vpop.f32.mrf.mxu1 }
 0x29b   : > { %v2799_v4 = vmul.f32 -1.442695, %v2375_v45  ;;  %v2234_v11 = vadd.f32 %v2233_v6, %v2063_v32  ;;  %v1940_v32 = vadd.f32 %v5195_v61, %v5151_v26  ;;  %v1947_v61 = vadd.f32 %v5199_v3, %v5156_v10 }
 0x29c   : > { %v3590_v13 = vpop.f32.mrf.mxu0  ;;  %v3643_v1 = vpop.f32.mrf.mxu1  ;;  %v1954_v10 = vadd.f32 %v5202_v56, %v5161_v7 }
 0x29d   : > { %3760 = vpow2.f32 %v2799_v4  ;;  %v2381_v36 = vadd.f32 %v2380_v23, %v2234_v11  ;;  %v1926_v23 = vadd.f32 %v5187_v15, %v5145_v59 }
 0x29e   : > { %v3755_v19 = vpop.eup %3754  ;;  %v2239_v40 = vpop.f32.mrf.mxu0 }
 0x29f   : > { %v2398_v18 = vpop.f32.mrf.mxu1  ;;  %v2471_v17 = vadd.f32 1.0, %v3755_v19  ;;  %v2800_v8 = vmul.f32 -1.442695, %v2381_v36  ;;  %v2240_v63 = vadd.f32 %v2239_v40, %v2071_v5  ;;  %v2095_v15 = vadd.f32 %v5181_v35, %v1926_v23 }
 0x2a0   : > { %v3593_v39 = vpop.f32.mrf.mxu0  ;;  %v2111_v36 = vadd.f32 %v5189_v21, %v1940_v32  ;;  %v2119_v21 = vadd.f32 %v5193_v42, %v1947_v61 }
 0x2a1   : > { %v3646_v38 = vpop.f32.mrf.mxu1  ;;  %3762 = vrcp.f32 %v2471_v17  ;;  %v2387_v37 = vadd.f32 %v2386_v54, %v2240_v63 }
 0x2a2   : > { %v3757_v44 = vpop.eup %3756  ;;  %3764 = vpow2.f32 %v2800_v8  ;;  %v2245_v16 = vpop.f32.mrf.mxu0 }
 0x2a3   : > { %v2404_v52 = vpop.f32.mrf.mxu1  ;;  %v2472_v22 = vadd.f32 1.0, %v3757_v44  ;;  %v2801_v50 = vmul.f32 -1.442695, %v2387_v37  ;;  %v2246_v28 = vadd.f32 %v2245_v16, %v2079_v20 }
 0x2a4   : > { %v3596_v53 = vpop.f32.mrf.mxu0 }
 0x2a5   : > { %v3649_v49 = vpop.f32.mrf.mxu1  ;;  %3766 = vrcp.f32 %v2472_v22  ;;  %v2393_v46 = vadd.f32 %v2392_v51, %v2246_v28  ;;  %v2127_v28 = vadd.f32 %v5197_v2, %v1954_v10 }
 0x2a6   : > { %v3759_v47 = vpop.eup %3758  ;;  %3768 = vpow2.f32 %v2801_v50  ;;  %v2251_v57 = vpop.f32.mrf.mxu0 }
 0x2a7   : > { %v2410_v24 = vpop.f32.mrf.mxu1  ;;  %v2473_v29 = vadd.f32 1.0, %v3759_v47  ;;  %v2802_v60 = vmul.f32 -1.442695, %v2393_v46  ;;  %v2252_v34 = vadd.f32 %v2251_v57, %v2087_v25 }
 0x2a8   : > { %v3599_v58 = vpop.f32.mrf.mxu0 }
 0x2a9   : > { %v3652_v14 = vpop.f32.mrf.mxu1  ;;  %3770 = vrcp.f32 %v2473_v29  ;;  %v2399_v59 = vadd.f32 %v2398_v18, %v2252_v34 }
 0x2aa   : > { %v3761_v54 = vpop.eup %3760  ;;  %3772 = vpow2.f32 %v2802_v60  ;;  %v2257_v55 = vpop.f32.mrf.mxu0 }
 0x2ab   : > { %v2416_v62 = vpop.f32.mrf.mxu1  ;;  %v2474_v41 = vadd.f32 1.0, %v3761_v54  ;;  %v2803_v43 = vmul.f32 -1.442695, %v2399_v59  ;;  %v2258_v48 = vadd.f32 %v2257_v55, %v2095_v15 }
 0x2ac   : > { %v3602_v33 = vpop.f32.mrf.mxu0 }
 0x2ad   : > { %v3655_v45 = vpop.f32.mrf.mxu1  ;;  %3774 = vrcp.f32 %v2474_v41  ;;  %v2405_v6 = vadd.f32 %v2404_v52, %v2258_v48 }
 0x2ae   : > { %v3763_v31 = vpop.eup %3762  ;;  %3776 = vpow2.f32 %v2803_v43  ;;  %v2263_v51 = vpop.f32.mrf.mxu0 }
 0x2af   : > { %v2422_v35 = vpop.f32.mrf.mxu1  ;;  %v3765_v4 = vpop.eup %3764  ;;  %2510 = vst.msk [vmem:[%s5232_s18] sm:$0xff] %vm274_vm1, %v3763_v31  ;;  %v2804_v11 = vmul.f32 -1.442695, %v2405_v6  ;;  %v2264_v13 = vadd.f32 %v2263_v51, %v2103_v27 }
 0x2b0   : > { %v2475_v1 = vadd.f32 1.0, %v3765_v4  ;;  %v3605_v9 = vpop.f32.mrf.mxu0 }
 0x2b1   : > { %v3658_v26 = vpop.f32.mrf.mxu1  ;;  %3778 = vpow2.f32 %v2804_v11  ;;  %v2411_v12 = vadd.f32 %v2410_v24, %v2264_v13 }
 0x2b2   : > { %v3767_v5 = vpop.eup %3766  ;;  %3780 = vrcp.f32 %v2475_v1  ;;  %v2269_v19 = vpop.f32.mrf.mxu0 }
 0x2b3   : > { %v2428_v40 = vpop.f32.mrf.mxu1  ;;  %v3769_v18 = vpop.eup %3768  ;;  %2511 = vst.msk [vmem:[%s5232_s18 + $0x8] sm:$0xff] %vm274_vm1, %v3767_v5  ;;  %v2805_v17 = vmul.f32 -1.442695, %v2411_v12  ;;  %v2270_v8 = vadd.f32 %v2269_v19, %v2111_v36 }
 0x2b4   : > { %v2476_v63 = vadd.f32 1.0, %v3769_v18  ;;  %v3608_v39 = vpop.f32.mrf.mxu0 }
 0x2b5   : > { %v3661_v38 = vpop.f32.mrf.mxu1  ;;  %3782 = vpow2.f32 %v2805_v17  ;;  %v2417_v3 = vadd.f32 %v2416_v62, %v2270_v8 }
 0x2b6   : > { %v3771_v30 = vpop.eup %3770  ;;  %3784 = vrcp.f32 %v2476_v63  ;;  %v2275_v37 = vpop.f32.mrf.mxu0 }
 0x2b7   : > { %v3773_v20 = vpop.eup %3772  ;;  %2512 = vst.msk [vmem:[%s5232_s18 + $0x10] sm:$0xff] %vm274_vm1, %v3771_v30  ;;  %v2806_v44 = vmul.f32 -1.442695, %v2417_v3  ;;  %v2276_v16 = vadd.f32 %v2275_v37, %v2119_v21 }
 0x2b8   : > { %v2477_v52 = vadd.f32 1.0, %v3773_v20  ;;  %v3611_v22 = vpop.f32.mrf.mxu0 }
 0x2b9   : > { %3786 = vpow2.f32 %v2806_v44  ;;  %v2423_v50 = vadd.f32 %v2422_v35, %v2276_v16 }
 0x2ba   : > { %v3775_v7 = vpop.eup %3774  ;;  %3788 = vrcp.f32 %v2477_v52  ;;  %v2281_v56 = vpop.f32.mrf.mxu0 }
 0x2bb   : > { %v3777_v42 = vpop.eup %3776  ;;  %2513 = vst.msk [vmem:[%s5232_s18 + $0x18] sm:$0xff] %vm274_vm1, %v3775_v7  ;;  %v2807_v53 = vmul.f32 -1.442695, %v2423_v50  ;;  %v2282_v49 = vadd.f32 %v2281_v56, %v2127_v28 }
 0x2bc   : > { %v2478_v23 = vadd.f32 1.0, %v3777_v42  ;;  %v3614_v46 = vpop.f32.mrf.mxu0 }
 0x2bd   : > { %3790 = vpow2.f32 %v2807_v53  ;;  %v2429_v25 = vadd.f32 %v2428_v40, %v2282_v49 }
 0x2be   : > { %v3779_v47 = vpop.eup %3778  ;;  %3792 = vrcp.f32 %v2478_v23 }
 0x2bf   : > { %v3781_v57 = vpop.eup %3780  ;;  %v2479_v24 = vadd.f32 1.0, %v3779_v47  ;;  %v2808_v2 = vmul.f32 -1.442695, %v2429_v25 }
 0x2c0   : > { %2514 = vst.msk [vmem:[%s5232_s18 + $0x20] sm:$0xff] %vm274_vm1, %v3781_v57 }
 0x2c1   : > { %3794 = vrcp.f32 %v2479_v24 }
 0x2c2   : > { %v3783_v29 = vpop.eup %3782  ;;  %3796 = vpow2.f32 %v2808_v2 }
 0x2c3   : > { %v3785_v60 = vpop.eup %3784  ;;  %v2480_v34 = vadd.f32 1.0, %v3783_v29 }
 0x2c4   : > { %2515 = vst.msk [vmem:[%s5232_s18 + $0x28] sm:$0xff] %vm274_vm1, %v3785_v60 }
 0x2c5   : > { %3798 = vrcp.f32 %v2480_v34 }
 0x2c6   : > { %v3787_v58 = vpop.eup %3786 }
 0x2c7   : > { %v3789_v14 = vpop.eup %3788  ;;  %v2481_v0 = vadd.f32 1.0, %v3787_v58 }
 0x2c8   : > { %2516 = vst.msk [vmem:[%s5232_s18 + $0x30] sm:$0xff] %vm274_vm1, %v3789_v14 }
 0x2c9   : > { %3800 = vrcp.f32 %v2481_v0 }
 0x2ca   : > { %v3791_v59 = vpop.eup %3790 }
 0x2cb   : > { %v3793_v15 = vpop.eup %3792  ;;  %v2482_v54 = vadd.f32 1.0, %v3791_v59 }
 0x2cc   : > { %2517 = vst.msk [vmem:[%s5232_s18 + $0x38] sm:$0xff] %vm274_vm1, %v3793_v15 }
 0x2cd   : > { %3802 = vrcp.f32 %v2482_v54 }
 0x2ce   : > { %v3795_v55 = vpop.eup %3794 }
 0x2cf   : > { %v3797_v62 = vpop.eup %3796  ;;  %2518 = vst.msk [vmem:[%s5232_s18 + $0x40] sm:$0xff] %vm274_vm1, %v3795_v55 }
 0x2d0   : > { %v2483_v41 = vadd.f32 1.0, %v3797_v62 }
 0x2d2   : > { %v3799_v43 = vpop.eup %3798  ;;  %3804 = vrcp.f32 %v2483_v41 }
 0x2d3   : > { %2519 = vst.msk [vmem:[%s5232_s18 + $0x48] sm:$0xff] %vm274_vm1, %v3799_v43 }
 0x2d6   : > { %v3801_v48 = vpop.eup %3800 }
 0x2d7   : > { %2520 = vst.msk [vmem:[%s5232_s18 + $0x50] sm:$0xff] %vm274_vm1, %v3801_v48 }
 0x2da   : > { %v3803_v33 = vpop.eup %3802 }
 0x2db   : > { %2521 = vst.msk [vmem:[%s5232_s18 + $0x58] sm:$0xff] %vm274_vm1, %v3803_v33 }
 0x2dc   : > { %2529 = sbr.rel (!%p3955_p4) target bundleno = 790 (0x316), region = 44 }
 0x2df   : > { %v3805_v45 = vpop.eup %3804 }
 0x2e0   : > { %2522 = vst.msk [vmem:[%s5232_s18 + $0x60] sm:$0xff] %vm274_vm1, %v3805_v45 }
 0x2e1   : > { %s5391_s24 = smov (!%p2532_p8, %s2531_s24), 13 }
 0x2e2   : > { %s2809_s6 = sshll.u32 %s5391_s24, 7 }
 0x2e3   : > { %p2812_p9 = scmp.eq.s32.totalorder %s2809_s6, 0 }
 0x2e4   : > { %3806 = sdivrem.u32 (!%p2812_p9), %s5391_s24, 13 }
 0x2e5   : > { %2540 = sbr.rel (%p2812_p9) target bundleno = 790 (0x316), region = 48 }
 0x2ed   : > { %s5280_s26 = spop.drf %3806 }
 0x2ee   : > { %p2813_p10 = scmp.le.s32.totalorder %s5280_s26, 0 }
 0x2ef   : > { %s5384_s21 = smov (!%p2813_p10), %s5274_s30  ;;  %s5385_s8 = smov (!%p2813_p10), %s5232_s18 }
 0x2f0   : > { %2745 = sbr.rel (%p2813_p10) target bundleno = 765 (0x2fd), region = 124  ;;  %s5289_s7 = smov (!%p2813_p10), 0  }
 0x2f1   : > { %s5291_s9 = smov (!%p2813_p10), 0  }
 0x2f5 LB: >> { %v2629_v32 = vld [vmem:[%s3872_s8] sm:$0xff]  ;;  %v2631_v6 = vld [vmem:[%s3872_s8 + $0x8] sm:$0xff]  ;;  %v2633_v27 = vld [vmem:[%s3872_s8 + $0x10] sm:$0xff]  ;;  %s2655_s10 = sadd.s32 1, %s3876_s7  ;;  %s2623_s9 = sadd.s32 1, %s3880_s9   ;;  %s3880_s9 = sphi %s5291_s9, %s2623_s9   ;;  %s3876_s7 = sphi %s5289_s7, %s5386_s7   ;;  %s3872_s8 = sphi %s5385_s8, %s2660_s8   ;;  %s3868_s21 = sphi %s5384_s21, %s2661_s21  }
 0x2f6   : >> { %2630 = vst [vmem:[%s3868_s21] sm:$0xff] %v2629_v32  ;;  %2632 = vst [vmem:[%s3868_s21 + $0x8] sm:$0xff] %v2631_v6  ;;  %v2635_v31 = vld [vmem:[%s3872_s8 + $0x18] sm:$0xff]  ;;  %v2637_v51 = vld [vmem:[%s3872_s8 + $0x20] sm:$0xff]  ;;  %p2656_p11 = scmp.ge.s32.totalorder %s2655_s10, %s5280_s26  ;;  %p2622_p12 = scmp.ge.s32.totalorder %s2623_s9, %s5280_s26 }
 0x2f7   : >> { %2634 = vst [vmem:[%s3868_s21 + $0x10] sm:$0xff] %v2633_v27  ;;  %v2639_v35 = vld [vmem:[%s3872_s8 + $0x28] sm:$0xff]  ;;  %2636 = vst [vmem:[%s3868_s21 + $0x18] sm:$0xff] %v2635_v31  ;;  %v2641_v4 = vld [vmem:[%s3872_s8 + $0x30] sm:$0xff] }
 0x2f8   : >> { %2638 = vst [vmem:[%s3868_s21 + $0x20] sm:$0xff] %v2637_v51  ;;  %2640 = vst [vmem:[%s3868_s21 + $0x28] sm:$0xff] %v2639_v35  ;;  %v2643_v11 = vld [vmem:[%s3872_s8 + $0x38] sm:$0xff]  ;;  %v2645_v13 = vld [vmem:[%s3872_s8 + $0x40] sm:$0xff]  ;;  %s5393_s10 = smov (%p2656_p11, %s2655_s10), 0  ;;  %2625 = sbr.rel (!%p2622_p12) target bundleno = 757 (0x2f5), region = 130 }
 0x2f9   : >> { %2642 = vst [vmem:[%s3868_s21 + $0x30] sm:$0xff] %v2641_v4  ;;  %2644 = vst [vmem:[%s3868_s21 + $0x38] sm:$0xff] %v2643_v11  ;;  %v2647_v1 = vld [vmem:[%s3872_s8 + $0x48] sm:$0xff]  ;;  %v2649_v9 = vld [vmem:[%s3872_s8 + $0x50] sm:$0xff]  ;;  %s2658_s11 = smul.u32 104, %s5393_s10  ;;  %s5386_s7 = smov %s5393_s10 }
 0x2fa   : >> { %2646 = vst [vmem:[%s3868_s21 + $0x40] sm:$0xff] %v2645_v13  ;;  %v2651_v26 = vld [vmem:[%s3872_s8 + $0x58] sm:$0xff]  ;;  %2648 = vst [vmem:[%s3868_s21 + $0x48] sm:$0xff] %v2647_v1  ;;  %v2653_v61 = vld [vmem:[%s3872_s8 + $0x60] sm:$0xff] }
 0x2fb   : >> { %2650 = vst [vmem:[%s3868_s21 + $0x50] sm:$0xff] %v2649_v9  ;;  %2652 = vst [vmem:[%s3868_s21 + $0x58] sm:$0xff] %v2651_v26  ;;  %s2660_s8 = scalar_lea.vmem %s5232_s18, %s2658_s11 [#allocation2]  }
 0x2fc   : >> { %2654 = vst [vmem:[%s3868_s21 + $0x60] sm:$0xff] %v2653_v61  ;;  %s2661_s21 = scalar_lea.vmem %s5274_s30, %s2658_s11  }
 0x2fd PF: > { %3808 = sdivrem.u32 %s5391_s24, 13 }
 0x2fe   : > { %s2814_s12 = smul.u32 104, %s5280_s26 }
 0x300   : > { %s2666_s13 = scalar_lea.vmem %s5232_s18, %s2814_s12 [#allocation2]   ;;  %s2668_s14 = scalar_lea.vmem %s5274_s30, %s2814_s12  }
 0x306   : > { %s3809_s15 = spop.drf %3808 }
 0x307   : > { %p2816_p13 = scmp.le.s32.totalorder %s3809_s15, 0 }
 0x308   : > { %s3882_s16 = smov (!%p2816_p13), %s2668_s14   ;;  %s3886_s17 = smov (!%p2816_p13), %s2666_s13  }
 0x309   : > { %2759 = sbr.rel (%p2816_p13) target bundleno = 790 (0x316), region = 135  ;;  %s3890_s20 = smov (!%p2816_p13), 0  }
 0x30a   : > { %s3894_s23 = smov (!%p2816_p13), 0  }
 0x30e LB: >> { %v2678_v12 = vld [vmem:[%s3888_s17] sm:$0xff]  ;;  %s2680_s27 = sadd.s32 1, %s3892_s20  ;;  %s2672_s23 = sadd.s32 1, %s3896_s23   ;;  %s3896_s23 = sphi %s3894_s23, %s2672_s23   ;;  %s3892_s20 = sphi %s3890_s20, %s3891_s20   ;;  %s3888_s17 = sphi %s3886_s17, %s2685_s17   ;;  %s3884_s16 = sphi %s3882_s16, %s2686_s16  }
 0x30f   : >> { %2679 = vst [vmem:[%s3884_s16] sm:$0xff] %v2678_v12  ;;  %p2681_p0 = scmp.ge.s32.totalorder %s2680_s27, %s3809_s15  ;;  %p2671_p1 = scmp.ge.s32.totalorder %s2672_s23, %s3809_s15 }
 0x311   : >> { %s5395_s27 = smov (%p2681_p0, %s2680_s27), 0  ;;  %2674 = sbr.rel (!%p2671_p1) target bundleno = 782 (0x30e), region = 141 }
 0x312   : >> { %s2817_s18 = sshll.u32 %s5395_s27, 3  ;;  %s3891_s20 = smov %s5395_s27  }
 0x313   : >> { %s2685_s17 = scalar_lea.vmem %s2666_s13, %s2817_s18 [#allocation2]   ;;  %s2686_s16 = scalar_lea.vmem %s2668_s14, %s2817_s18  }
 0x316 PF: > { %p12_p2 = scmp.ge.s32.totalorder %s3945_s22, 4   ;;  %s5387_s18 = smov %s3860_s19 }
 0x317   : > { %s5388_s19 = smov %s3953_s25  ;;  %s5389_s20 = smov %s3945_s22 }
 0x318   :  { %14 = sbr.rel (!%p12_p2) target bundleno = 2 (0x2), region = 152 }

</bundles_post_ra>
